<compile_context>
chip_gen: v7x
topology: tpu7x:2x2x1
jax: 0.10.0
libtpu: 0.0.40
codegen_flags: <defaults>
</compile_context>

<pallas_src>
import functools
import math

import jax
import jax.numpy as jnp
from jax.experimental import pallas as pl
from jax.experimental.pallas import tpu as pltpu


MATMUL_INPUT_DTYPE = jnp.float32   # jnp.bfloat16 for 2x MXU rate on v5e/v6e


def _round_up(x, m):
    return ((x + m - 1) // m) * m


# ----------------------------------------------------------------------------
# Tiled dense matmul (+ optional bias, + optional relu)
# ----------------------------------------------------------------------------
def _matmul_kernel(x_ref, w_ref, o_ref, acc_ref, *, relu):
    @pl.when(pl.program_id(2) == 0)
    def _init():
        acc_ref[...] = jnp.zeros_like(acc_ref)

    acc_ref[...] += jnp.dot(x_ref[...], w_ref[...],
                            preferred_element_type=jnp.float32)

    @pl.when(pl.program_id(2) == pl.num_programs(2) - 1)
    def _store():
        out = acc_ref[...]
        if relu:
            out = jnp.maximum(out, 0.0)
        o_ref[...] = out.astype(o_ref.dtype)


def _matmul_bias_kernel(x_ref, w_ref, b_ref, o_ref, acc_ref, *, relu):
    @pl.when(pl.program_id(2) == 0)
    def _init():
        acc_ref[...] = jnp.zeros_like(acc_ref)

    acc_ref[...] += jnp.dot(x_ref[...], w_ref[...],
                            preferred_element_type=jnp.float32)

    @pl.when(pl.program_id(2) == pl.num_programs(2) - 1)
    def _store():
        out = acc_ref[...] + b_ref[...].astype(jnp.float32)   # bias add in f32
        if relu:
            out = jnp.maximum(out, 0.0)
        o_ref[...] = out.astype(o_ref.dtype)


def dense(x2d, w, b=None, relu=False, tm_max=256, tn_max=256, tk_max=512):
    """(M,K) @ (K,N) [+ bias] [+ relu], tiled for the MXU.

    Inputs are zero-padded to lane-dense tile multiples (128 on N/K, 8 on M);
    the K zero-padding is exact (adds zero to the accumulator), padded M rows /
    N cols are sliced off.  Tile sizes keep double-buffered VMEM usage well
    under the 32 MiB scoped default (v7x safe)."""
    M, K = x2d.shape
    K2, N = w.shape
    assert K == K2
    out_dtype = x2d.dtype

    tm = min(tm_max, _round_up(M, 8))
    tn = min(tn_max, _round_up(N, 128))
    tk = min(tk_max, _round_up(K, 128))
    Mp, Kp, Np = _round_up(M, tm), _round_up(K, tk), _round_up(N, tn)

    xp = x2d if (Mp, Kp) == (M, K) else jnp.pad(x2d, ((0, Mp - M), (0, Kp - K)))
    wp = w if (Kp, Np) == (K, N) else jnp.pad(w, ((0, Kp - K), (0, Np - N)))
    xp = xp.astype(MATMUL_INPUT_DTYPE)
    wp = wp.astype(MATMUL_INPUT_DTYPE)

    grid = (Mp // tm, Np // tn, Kp // tk)
    x_spec = pl.BlockSpec((tm, tk), lambda i, j, k: (i, k))
    w_spec = pl.BlockSpec((tk, tn), lambda i, j, k: (k, j))
    o_spec = pl.BlockSpec((tm, tn), lambda i, j, k: (i, j))
    cparams = pltpu.CompilerParams(
        dimension_semantics=("parallel", "parallel", "arbitrary"))
    scratch = [pltpu.VMEM((tm, tn), jnp.float32)]

    if b is not None:
        bp = b.astype(jnp.float32).reshape(1, N)
        if Np != N:
            bp = jnp.pad(bp, ((0, 0), (0, Np - N)))
        out = pl.pallas_call(
            functools.partial(_matmul_bias_kernel, relu=relu),
            out_shape=jax.ShapeDtypeStruct((Mp, Np), out_dtype),
            grid=grid,
            in_specs=[x_spec, w_spec,
                      pl.BlockSpec((1, tn), lambda i, j, k: (0, j))],
            out_specs=o_spec,
            scratch_shapes=scratch,
            compiler_params=cparams,
        )(xp, wp, bp)
    else:
        out = pl.pallas_call(
            functools.partial(_matmul_kernel, relu=relu),
            out_shape=jax.ShapeDtypeStruct((Mp, Np), out_dtype),
            grid=grid,
            in_specs=[x_spec, w_spec],
            out_specs=o_spec,
            scratch_shapes=scratch,
            compiler_params=cparams,
        )(xp, wp)

    if (Mp, Np) != (M, N):
        out = out[:M, :N]
    return out


# ----------------------------------------------------------------------------
# Fused residual-add + series_decomp (returns the seasonal residual only)
# ----------------------------------------------------------------------------
def _add_decomp_kernel(a_ref, b_ref, res_ref, sp_ref, *, k):
    """res = s - moving_avg(s), s = a + b, replicate-padded window of size k
    (odd).  Padded series is built in a VMEM scratch — no HBM-side padding."""
    pad = (k - 1) // 2
    s = a_ref[0].astype(jnp.float32) + b_ref[0].astype(jnp.float32)   # (L, D)
    L, D = s.shape
    sp_ref[pl.ds(pad, L), :] = s
    if pad > 0:
        sp_ref[pl.ds(0, pad), :] = jnp.broadcast_to(s[0:1, :], (pad, D))
        sp_ref[pl.ds(pad + L, pad), :] = jnp.broadcast_to(s[L - 1:L, :], (pad, D))
    acc = jnp.zeros((L, D), jnp.float32)
    for i in range(k):                     # small static window -> unrolled
        acc = acc + sp_ref[pl.ds(i, L), :]
    res_ref[0] = (s - acc * (1.0 / k)).astype(res_ref.dtype)


def add_series_decomp(a, b, k):
    """series_decomp(a + b)[0]  (the moving-average output is unused upstream)."""
    B, L, D = a.shape
    pad = (k - 1) // 2
    spec = pl.BlockSpec((1, L, D), lambda bb: (bb, 0, 0))
    return pl.pallas_call(
        functools.partial(_add_decomp_kernel, k=k),
        out_shape=jax.ShapeDtypeStruct((B, L, D), a.dtype),
        grid=(B,),
        in_specs=[spec, spec],
        out_specs=spec,
        scratch_shapes=[pltpu.VMEM((L + 2 * pad, D), jnp.float32)],
        compiler_params=pltpu.CompilerParams(dimension_semantics=("parallel",)),
    )(a, b)


# ----------------------------------------------------------------------------
# my_Layernorm: LayerNorm over D, then subtract the mean over time (L)
# ----------------------------------------------------------------------------
def _layernorm_kernel(x_ref, g_ref, b_ref, o_ref, *, eps):
    x = x_ref[0].astype(jnp.float32)                       # (L, D)
    mean = jnp.mean(x, axis=-1, keepdims=True)
    var = jnp.mean((x - mean) ** 2, axis=-1, keepdims=True)
    x_hat = (x - mean) * jax.lax.rsqrt(var + eps)
    x_hat = x_hat * g_ref[...] + b_ref[...]                # (1, D) f32 broadcast
    bias = jnp.mean(x_hat, axis=0, keepdims=True)          # time mean
    o_ref[0] = (x_hat - bias).astype(o_ref.dtype)


def my_layernorm(x, gamma, beta, eps=1e-5):
    B, L, D = x.shape
    g = gamma.reshape(1, D).astype(jnp.float32)
    bt = beta.reshape(1, D).astype(jnp.float32)
    xspec = pl.BlockSpec((1, L, D), lambda b: (b, 0, 0))
    pspec = pl.BlockSpec((1, D), lambda b: (0, 0))
    return pl.pallas_call(
        functools.partial(_layernorm_kernel, eps=eps),
        out_shape=jax.ShapeDtypeStruct((B, L, D), x.dtype),
        grid=(B,),
        in_specs=[xspec, pspec, pspec],
        out_specs=xspec,
        compiler_params=pltpu.CompilerParams(dimension_semantics=("parallel",)),
    )(x, g, bt)


# ----------------------------------------------------------------------------
# AutoCorrelation (FFT + time-delay aggregation) — plain-JAX glue
# ----------------------------------------------------------------------------
def autocorrelation(q, k, v, factor):
    """q, k, v: (B, L, D), channel-flattened.  Eval-mode
    (time_delay_agg_inference) semantics.  Per-(head,channel) correlations
    averaged over heads AND channels equal per-channel correlations averaged
    over D, so the head split never changes the result."""
    B, L, D = q.shape
    qp = jnp.transpose(q, (0, 2, 1))                       # (B, D, L)
    kp = jnp.transpose(k, (0, 2, 1))

    # TODO(synk): FFT has no Pallas TPU equivalent; rFFT/irFFT use XLA's FFT.
    q_fft = jnp.fft.rfft(qp, axis=-1)
    k_fft = jnp.fft.rfft(kp, axis=-1)
    corr = jnp.fft.irfft(q_fft * jnp.conj(k_fft), n=L, axis=-1)   # (B, D, L)

    top_k = max(1, int(factor * math.log(L)))
    mean_value = jnp.mean(corr, axis=1)                    # (B, L)
    weights, delay = jax.lax.top_k(mean_value, top_k)      # (B, top_k)
    tmp_corr = jax.nn.softmax(weights, axis=-1)

    # TODO(synk): the data-dependent per-batch circular gather stays in plain
    # JAX (dynamic delays don't fit a static Pallas index_map cleanly); the
    # reference's doubled (B,H,E,2L) buffer is replaced by an equivalent mod-L
    # gather on (B, L, D), halving HBM traffic on this path.
    init_index = jnp.arange(L, dtype=jnp.int32)
    agg = jnp.zeros_like(v)
    for i in range(top_k):
        idx = (init_index[None, :] + delay[:, i][:, None]) % L    # (B, L)
        idx = jnp.broadcast_to(idx[:, :, None], v.shape)
        pattern = jnp.take_along_axis(v, idx, axis=1)
        agg = agg + pattern * tmp_corr[:, i][:, None, None]
    return agg                                             # (B, L, D)


def autocorrelation_layer(x, p, factor, n_heads):
    # n_heads is kept for signature fidelity; see autocorrelation() docstring.
    B, L, D = x.shape
    x2 = x.reshape(B * L, D)
    qkv = dense(x2, p["wqkv"], p["bqkv"])                  # fused Q|K|V projection
    q = qkv[:, :D].reshape(B, L, D)
    k = qkv[:, D:2 * D].reshape(B, L, D)
    v = qkv[:, 2 * D:].reshape(B, L, D)
    out = autocorrelation(q, k, v, factor)                 # (B, L, D)
    return dense(out.reshape(B * L, D), p["wo"], p["bo"]).reshape(B, L, D)


# ----------------------------------------------------------------------------
# EncoderLayer and Encoder forward (dropout is identity in eval mode)
# ----------------------------------------------------------------------------
def encoder_layer(x, p, moving_avg, factor, n_heads):
    B, L, D = x.shape
    new_x = autocorrelation_layer(x, p, factor, n_heads)
    x = add_series_decomp(x, new_x, moving_avg)            # (x + attn) -> decomp
    y2 = x.reshape(B * L, D)
    y2 = dense(y2, p["w1"], relu=True)                     # Conv1d k=1, bias=False, relu
    y2 = dense(y2, p["w2"])                                # Conv1d k=1, bias=False
    y = y2.reshape(B, L, D)
    return add_series_decomp(x, y, moving_avg)             # (x + ffn) -> decomp


def encoder_forward(x, params, moving_avg, factor, n_heads, attn_mask=None):
    # attn_mask is ignored, matching AutoCorrelation in the reference.
    # conv_layers is None -> plain loop over attn_layers, then norm.
    del attn_mask
    for p in params["attn_layers"]:
        x = encoder_layer(x, p, moving_avg, factor, n_heads)
    x = my_layernorm(x, params["norm_gamma"], params["norm_beta"])
    return x


# ----------------------------------------------------------------------------
# Deterministic parameter init (Q/K/V weights stored fused as (D, 3D))
# ----------------------------------------------------------------------------
def init_params(key, n_layers, d_model, d_ff):
    params = {"attn_layers": []}
    for _ in range(n_layers):
        key, *ks = jax.random.split(key, 11)
        s = 0.05
        wq = s * jax.random.normal(ks[0], (d_model, d_model), jnp.float32)
        bq = s * jax.random.normal(ks[1], (d_model,), jnp.float32)
        wk = s * jax.random.normal(ks[2], (d_model, d_model), jnp.float32)
        bk = s * jax.random.normal(ks[3], (d_model,), jnp.float32)
        wv = s * jax.random.normal(ks[4], (d_model, d_model), jnp.float32)
        bv = s * jax.random.normal(ks[5], (d_model,), jnp.float32)
        p = {
            "wqkv": jnp.concatenate([wq, wk, wv], axis=1),          # (D, 3D)
            "bqkv": jnp.concatenate([bq, bk, bv], axis=0),          # (3D,)
            "wo": s * jax.random.normal(ks[6], (d_model, d_model), jnp.float32),
            "bo": s * jax.random.normal(ks[7], (d_model,), jnp.float32),
            "w1": s * jax.random.normal(ks[8], (d_model, d_ff), jnp.float32),
            "w2": s * jax.random.normal(ks[9], (d_ff, d_model), jnp.float32),
        }
        params["attn_layers"].append(p)
    params["norm_gamma"] = jnp.ones((d_model,), jnp.float32)
    params["norm_beta"] = jnp.zeros((d_model,), jnp.float32)
    return params


# ----------------------------------------------------------------------------
if __name__ == "__main__":
    B, L, D, H, DFF = 2, 16, 32, 4, 64
    N_LAYERS = 2
    MOVING_AVG = 5
    FACTOR = 1

    key = jax.random.PRNGKey(0)
    kp, kx = jax.random.split(key)
    params = init_params(kp, N_LAYERS, D, DFF)
    x = jax.random.normal(kx, (B, L, D), jnp.float32)

    fwd = jax.jit(lambda xx: encoder_forward(
        xx, params, moving_avg=MOVING_AVG, factor=FACTOR, n_heads=H))
    out = fwd(x)
    jax.block_until_ready(out)
    assert out.shape == (B, L, D)
    assert jnp.all(jnp.isfinite(out))
    print("KERNEL_OK")
</pallas_src>

<mosaic_0001>
module attributes {stable_mosaic.version = 11 : i64} {
  func.func @_matmul_bias_kernel(%arg0: i32, %arg1: i32, %arg2: i32, %arg3: memref<32x128xf32, #tpu.memory_space<vmem>>, %arg4: memref<128x128xf32, #tpu.memory_space<vmem>>, %arg5: memref<1x128xf32, #tpu.memory_space<vmem>>, %arg6: memref<32x128xf32, #tpu.memory_space<vmem>>, %arg7: memref<32x128xf32, #tpu.memory_space<vmem>>) attributes {dimension_semantics = [#tpu.dimension_semantics<parallel>, #tpu.dimension_semantics<parallel>, #tpu.dimension_semantics<arbitrary>], iteration_bounds = array<i64: 1, 1, 1>, scalar_prefetch = 0 : i64, scratch_operands = 1 : i64, tpu.core_type = #tpu.core_type<tc>, window_params = [{transform_indices = @transform_0, window_bounds = array<i64: 32, 128>}, {transform_indices = @transform_1, window_bounds = array<i64: 128, 128>}, {transform_indices = @transform_2, window_bounds = array<i64: 1, 128>}, {transform_indices = @transform_3, window_bounds = array<i64: 32, 128>}]} {
    %c0_i32 = arith.constant 0 : i32
    %0 = arith.cmpi eq, %arg2, %c0_i32 : i32
    %1 = arith.extui %0 : i1 to i32
    %c0_i32_0 = arith.constant 0 : i32
    %2 = arith.cmpi ne, %1, %c0_i32_0 : i32
    scf.if %2 {
      %cst_10 = arith.constant 0.000000e+00 : f32
      %12 = vector.broadcast %cst_10 : f32 to vector<32x128xf32>
      %c0_11 = arith.constant 0 : index
      %c0_12 = arith.constant 0 : index
      %13 = vector.load %arg7[%c0_11, %c0_12] : memref<32x128xf32, #tpu.memory_space<vmem>>, vector<32x128xf32>
      tpu.vector_store %arg7[%c0_11, %c0_12], %12 {strides = array<i32>} : memref<32x128xf32, #tpu.memory_space<vmem>>, vector<32x128xf32>,
    } else {
    }
    %c0 = arith.constant 0 : index
    %c0_1 = arith.constant 0 : index
    %3 = vector.load %arg7[%c0, %c0_1] : memref<32x128xf32, #tpu.memory_space<vmem>>, vector<32x128xf32>
    %c0_2 = arith.constant 0 : index
    %c0_3 = arith.constant 0 : index
    %4 = vector.load %arg3[%c0_2, %c0_3] : memref<32x128xf32, #tpu.memory_space<vmem>>, vector<32x128xf32>
    %c0_4 = arith.constant 0 : index
    %c0_5 = arith.constant 0 : index
    %5 = vector.load %arg4[%c0_4, %c0_5] : memref<128x128xf32, #tpu.memory_space<vmem>>, vector<128x128xf32>
    %cst = arith.constant dense<0.000000e+00> : vector<32x128xf32>
    %6 = tpu.matmul %4, %5, %cst {dimension_numbers = #tpu.dot_dimension_numbers<[1], [0], [0], [1], [0, 0, 1, 1], [], []>} : vector<32x128xf32>, vector<128x128xf32>, vector<32x128xf32> -> vector<32x128xf32>
    %7 = arith.addf %3, %6 : vector<32x128xf32>
    %c0_6 = arith.constant 0 : index
    %c0_7 = arith.constant 0 : index
    %8 = vector.load %arg7[%c0_6, %c0_7] : memref<32x128xf32, #tpu.memory_space<vmem>>, vector<32x128xf32>
    tpu.vector_store %arg7[%c0_6, %c0_7], %7 {strides = array<i32>} : memref<32x128xf32, #tpu.memory_space<vmem>>, vector<32x128xf32>,
    %c0_i32_8 = arith.constant 0 : i32
    %9 = arith.cmpi eq, %arg2, %c0_i32_8 : i32
    %10 = arith.extui %9 : i1 to i32
    %c0_i32_9 = arith.constant 0 : i32
    %11 = arith.cmpi ne, %10, %c0_i32_9 : i32
    scf.if %11 {
      %c0_10 = arith.constant 0 : index
      %c0_11 = arith.constant 0 : index
      %12 = vector.load %arg7[%c0_10, %c0_11] : memref<32x128xf32, #tpu.memory_space<vmem>>, vector<32x128xf32>
      %c0_12 = arith.constant 0 : index
      %c0_13 = arith.constant 0 : index
      %13 = vector.load %arg5[%c0_12, %c0_13] : memref<1x128xf32, #tpu.memory_space<vmem>>, vector<1x128xf32>
      %14 = vector.broadcast %13 : vector<1x128xf32> to vector<32x128xf32>
      %15 = arith.addf %12, %14 : vector<32x128xf32>
      %c0_14 = arith.constant 0 : index
      %c0_15 = arith.constant 0 : index
      %16 = vector.load %arg6[%c0_14, %c0_15] : memref<32x128xf32, #tpu.memory_space<vmem>>, vector<32x128xf32>
      tpu.vector_store %arg6[%c0_14, %c0_15], %15 {strides = array<i32>} : memref<32x128xf32, #tpu.memory_space<vmem>>, vector<32x128xf32>,
    } else {
    }
    return
  }
  func.func @transform_0(%arg0: i32, %arg1: i32, %arg2: i32) -> (i32, i32) {
    %c0_i32 = arith.constant 0 : i32
    return %arg0, %arg2 : i32, i32
  }
  func.func @transform_1(%arg0: i32, %arg1: i32, %arg2: i32) -> (i32, i32) {
    %c0_i32 = arith.constant 0 : i32
    return %arg2, %arg1 : i32, i32
  }
  func.func @transform_2(%arg0: i32, %arg1: i32, %arg2: i32) -> (i32, i32) {
    %c0_i32 = arith.constant 0 : i32
    %c0_i32_0 = arith.constant 0 : i32
    return %c0_i32, %arg1 : i32, i32
  }
  func.func @transform_3(%arg0: i32, %arg1: i32, %arg2: i32) -> (i32, i32) {
    %c0_i32 = arith.constant 0 : i32
    return %arg0, %arg1 : i32, i32
  }
}

module attributes {stable_mosaic.version = 11 : i64} {
  func.func @_matmul_kernel(%arg0: i32, %arg1: i32, %arg2: i32, %arg3: memref<32x128xf32, #tpu.memory_space<vmem>>, %arg4: memref<128x128xf32, #tpu.memory_space<vmem>>, %arg5: memref<32x128xf32, #tpu.memory_space<vmem>>, %arg6: memref<32x128xf32, #tpu.memory_space<vmem>>) attributes {dimension_semantics = [#tpu.dimension_semantics<parallel>, #tpu.dimension_semantics<parallel>, #tpu.dimension_semantics<arbitrary>], iteration_bounds = array<i64: 1, 1, 1>, scalar_prefetch = 0 : i64, scratch_operands = 1 : i64, tpu.core_type = #tpu.core_type<tc>, window_params = [{transform_indices = @transform_0, window_bounds = array<i64: 32, 128>}, {transform_indices = @transform_1, window_bounds = array<i64: 128, 128>}, {transform_indices = @transform_2, window_bounds = array<i64: 32, 128>}]} {
    %c0_i32 = arith.constant 0 : i32
    %0 = arith.cmpi eq, %arg2, %c0_i32 : i32
    %1 = arith.extui %0 : i1 to i32
    %c0_i32_0 = arith.constant 0 : i32
    %2 = arith.cmpi ne, %1, %c0_i32_0 : i32
    scf.if %2 {
      %cst_10 = arith.constant 0.000000e+00 : f32
      %12 = vector.broadcast %cst_10 : f32 to vector<32x128xf32>
      %c0_11 = arith.constant 0 : index
      %c0_12 = arith.constant 0 : index
      %13 = vector.load %arg6[%c0_11, %c0_12] : memref<32x128xf32, #tpu.memory_space<vmem>>, vector<32x128xf32>
      tpu.vector_store %arg6[%c0_11, %c0_12], %12 {strides = array<i32>} : memref<32x128xf32, #tpu.memory_space<vmem>>, vector<32x128xf32>,
    } else {
    }
    %c0 = arith.constant 0 : index
    %c0_1 = arith.constant 0 : index
    %3 = vector.load %arg6[%c0, %c0_1] : memref<32x128xf32, #tpu.memory_space<vmem>>, vector<32x128xf32>
    %c0_2 = arith.constant 0 : index
    %c0_3 = arith.constant 0 : index
    %4 = vector.load %arg3[%c0_2, %c0_3] : memref<32x128xf32, #tpu.memory_space<vmem>>, vector<32x128xf32>
    %c0_4 = arith.constant 0 : index
    %c0_5 = arith.constant 0 : index
    %5 = vector.load %arg4[%c0_4, %c0_5] : memref<128x128xf32, #tpu.memory_space<vmem>>, vector<128x128xf32>
    %cst = arith.constant dense<0.000000e+00> : vector<32x128xf32>
    %6 = tpu.matmul %4, %5, %cst {dimension_numbers = #tpu.dot_dimension_numbers<[1], [0], [0], [1], [0, 0, 1, 1], [], []>} : vector<32x128xf32>, vector<128x128xf32>, vector<32x128xf32> -> vector<32x128xf32>
    %7 = arith.addf %3, %6 : vector<32x128xf32>
    %c0_6 = arith.constant 0 : index
    %c0_7 = arith.constant 0 : index
    %8 = vector.load %arg6[%c0_6, %c0_7] : memref<32x128xf32, #tpu.memory_space<vmem>>, vector<32x128xf32>
    tpu.vector_store %arg6[%c0_6, %c0_7], %7 {strides = array<i32>} : memref<32x128xf32, #tpu.memory_space<vmem>>, vector<32x128xf32>,
    %c0_i32_8 = arith.constant 0 : i32
    %9 = arith.cmpi eq, %arg2, %c0_i32_8 : i32
    %10 = arith.extui %9 : i1 to i32
    %c0_i32_9 = arith.constant 0 : i32
    %11 = arith.cmpi ne, %10, %c0_i32_9 : i32
    scf.if %11 {
      %c0_10 = arith.constant 0 : index
      %c0_11 = arith.constant 0 : index
      %12 = vector.load %arg6[%c0_10, %c0_11] : memref<32x128xf32, #tpu.memory_space<vmem>>, vector<32x128xf32>
      %cst_12 = arith.constant 0.000000e+00 : f32
      %13 = vector.broadcast %cst_12 : f32 to vector<32x128xf32>
      %14 = arith.maximumf %12, %13 : vector<32x128xf32>
      %c0_13 = arith.constant 0 : index
      %c0_14 = arith.constant 0 : index
      %15 = vector.load %arg5[%c0_13, %c0_14] : memref<32x128xf32, #tpu.memory_space<vmem>>, vector<32x128xf32>
      tpu.vector_store %arg5[%c0_13, %c0_14], %14 {strides = array<i32>} : memref<32x128xf32, #tpu.memory_space<vmem>>, vector<32x128xf32>,
    } else {
    }
    return
  }
  func.func @transform_0(%arg0: i32, %arg1: i32, %arg2: i32) -> (i32, i32) {
    %c0_i32 = arith.constant 0 : i32
    return %arg0, %arg2 : i32, i32
  }
  func.func @transform_1(%arg0: i32, %arg1: i32, %arg2: i32) -> (i32, i32) {
    %c0_i32 = arith.constant 0 : i32
    return %arg2, %arg1 : i32, i32
  }
  func.func @transform_2(%arg0: i32, %arg1: i32, %arg2: i32) -> (i32, i32) {
    %c0_i32 = arith.constant 0 : i32
    return %arg0, %arg1 : i32, i32
  }
}

module attributes {stable_mosaic.version = 11 : i64} {
  func.func @_matmul_bias_kernel(%arg0: i32, %arg1: i32, %arg2: i32, %arg3: memref<32x128xf32, #tpu.memory_space<vmem>>, %arg4: memref<128x128xf32, #tpu.memory_space<vmem>>, %arg5: memref<1x128xf32, #tpu.memory_space<vmem>>, %arg6: memref<32x128xf32, #tpu.memory_space<vmem>>, %arg7: memref<32x128xf32, #tpu.memory_space<vmem>>) attributes {dimension_semantics = [#tpu.dimension_semantics<parallel>, #tpu.dimension_semantics<parallel>, #tpu.dimension_semantics<arbitrary>], iteration_bounds = array<i64: 1, 1, 1>, scalar_prefetch = 0 : i64, scratch_operands = 1 : i64, tpu.core_type = #tpu.core_type<tc>, window_params = [{transform_indices = @transform_0, window_bounds = array<i64: 32, 128>}, {transform_indices = @transform_1, window_bounds = array<i64: 128, 128>}, {transform_indices = @transform_2, window_bounds = array<i64: 1, 128>}, {transform_indices = @transform_3, window_bounds = array<i64: 32, 128>}]} {
    %c0_i32 = arith.constant 0 : i32
    %0 = arith.cmpi eq, %arg2, %c0_i32 : i32
    %1 = arith.extui %0 : i1 to i32
    %c0_i32_0 = arith.constant 0 : i32
    %2 = arith.cmpi ne, %1, %c0_i32_0 : i32
    scf.if %2 {
      %cst_10 = arith.constant 0.000000e+00 : f32
      %12 = vector.broadcast %cst_10 : f32 to vector<32x128xf32>
      %c0_11 = arith.constant 0 : index
      %c0_12 = arith.constant 0 : index
      %13 = vector.load %arg7[%c0_11, %c0_12] : memref<32x128xf32, #tpu.memory_space<vmem>>, vector<32x128xf32>
      tpu.vector_store %arg7[%c0_11, %c0_12], %12 {strides = array<i32>} : memref<32x128xf32, #tpu.memory_space<vmem>>, vector<32x128xf32>,
    } else {
    }
    %c0 = arith.constant 0 : index
    %c0_1 = arith.constant 0 : index
    %3 = vector.load %arg7[%c0, %c0_1] : memref<32x128xf32, #tpu.memory_space<vmem>>, vector<32x128xf32>
    %c0_2 = arith.constant 0 : index
    %c0_3 = arith.constant 0 : index
    %4 = vector.load %arg3[%c0_2, %c0_3] : memref<32x128xf32, #tpu.memory_space<vmem>>, vector<32x128xf32>
    %c0_4 = arith.constant 0 : index
    %c0_5 = arith.constant 0 : index
    %5 = vector.load %arg4[%c0_4, %c0_5] : memref<128x128xf32, #tpu.memory_space<vmem>>, vector<128x128xf32>
    %cst = arith.constant dense<0.000000e+00> : vector<32x128xf32>
    %6 = tpu.matmul %4, %5, %cst {dimension_numbers = #tpu.dot_dimension_numbers<[1], [0], [0], [1], [0, 0, 1, 1], [], []>} : vector<32x128xf32>, vector<128x128xf32>, vector<32x128xf32> -> vector<32x128xf32>
    %7 = arith.addf %3, %6 : vector<32x128xf32>
    %c0_6 = arith.constant 0 : index
    %c0_7 = arith.constant 0 : index
    %8 = vector.load %arg7[%c0_6, %c0_7] : memref<32x128xf32, #tpu.memory_space<vmem>>, vector<32x128xf32>
    tpu.vector_store %arg7[%c0_6, %c0_7], %7 {strides = array<i32>} : memref<32x128xf32, #tpu.memory_space<vmem>>, vector<32x128xf32>,
    %c0_i32_8 = arith.constant 0 : i32
    %9 = arith.cmpi eq, %arg2, %c0_i32_8 : i32
    %10 = arith.extui %9 : i1 to i32
    %c0_i32_9 = arith.constant 0 : i32
    %11 = arith.cmpi ne, %10, %c0_i32_9 : i32
    scf.if %11 {
      %c0_10 = arith.constant 0 : index
      %c0_11 = arith.constant 0 : index
      %12 = vector.load %arg7[%c0_10, %c0_11] : memref<32x128xf32, #tpu.memory_space<vmem>>, vector<32x128xf32>
      %c0_12 = arith.constant 0 : index
      %c0_13 = arith.constant 0 : index
      %13 = vector.load %arg5[%c0_12, %c0_13] : memref<1x128xf32, #tpu.memory_space<vmem>>, vector<1x128xf32>
      %14 = vector.broadcast %13 : vector<1x128xf32> to vector<32x128xf32>
      %15 = arith.addf %12, %14 : vector<32x128xf32>
      %c0_14 = arith.constant 0 : index
      %c0_15 = arith.constant 0 : index
      %16 = vector.load %arg6[%c0_14, %c0_15] : memref<32x128xf32, #tpu.memory_space<vmem>>, vector<32x128xf32>
      tpu.vector_store %arg6[%c0_14, %c0_15], %15 {strides = array<i32>} : memref<32x128xf32, #tpu.memory_space<vmem>>, vector<32x128xf32>,
    } else {
    }
    return
  }
  func.func @transform_0(%arg0: i32, %arg1: i32, %arg2: i32) -> (i32, i32) {
    %c0_i32 = arith.constant 0 : i32
    return %arg0, %arg2 : i32, i32
  }
  func.func @transform_1(%arg0: i32, %arg1: i32, %arg2: i32) -> (i32, i32) {
    %c0_i32 = arith.constant 0 : i32
    return %arg2, %arg1 : i32, i32
  }
  func.func @transform_2(%arg0: i32, %arg1: i32, %arg2: i32) -> (i32, i32) {
    %c0_i32 = arith.constant 0 : i32
    %c0_i32_0 = arith.constant 0 : i32
    return %c0_i32, %arg1 : i32, i32
  }
  func.func @transform_3(%arg0: i32, %arg1: i32, %arg2: i32) -> (i32, i32) {
    %c0_i32 = arith.constant 0 : i32
    return %arg0, %arg1 : i32, i32
  }
}

module attributes {stable_mosaic.version = 11 : i64} {
  func.func @_add_decomp_kernel(%arg0: i32, %arg1: memref<1x16x32xf32, #tpu.memory_space<vmem>>, %arg2: memref<1x16x32xf32, #tpu.memory_space<vmem>>, %arg3: memref<1x16x32xf32, #tpu.memory_space<vmem>>, %arg4: memref<20x32xf32, #tpu.memory_space<vmem>>) attributes {dimension_semantics = [#tpu.dimension_semantics<parallel>], iteration_bounds = array<i64: 2>, scalar_prefetch = 0 : i64, scratch_operands = 1 : i64, tpu.core_type = #tpu.core_type<tc>, window_params = [{transform_indices = @transform_0, window_bounds = array<i64: 1, 16, 32>}, {transform_indices = @transform_1, window_bounds = array<i64: 1, 16, 32>}, {transform_indices = @transform_2, window_bounds = array<i64: 1, 16, 32>}]} {
    %c0 = arith.constant 0 : index
    %c0_0 = arith.constant 0 : index
    %c0_1 = arith.constant 0 : index
    %0 = vector.load %arg1[%c0, %c0_0, %c0_1] : memref<1x16x32xf32, #tpu.memory_space<vmem>>, vector<1x16x32xf32>
    %1 = vector.shape_cast %0 : vector<1x16x32xf32> to vector<16x32xf32>
    %c0_2 = arith.constant 0 : index
    %c0_3 = arith.constant 0 : index
    %c0_4 = arith.constant 0 : index
    %2 = vector.load %arg2[%c0_2, %c0_3, %c0_4] : memref<1x16x32xf32, #tpu.memory_space<vmem>>, vector<1x16x32xf32>
    %3 = vector.shape_cast %2 : vector<1x16x32xf32> to vector<16x32xf32>
    %4 = arith.addf %1, %3 : vector<16x32xf32>
    %c2 = arith.constant 2 : index
    %c0_5 = arith.constant 0 : index
    %5 = vector.load %arg4[%c2, %c0_5] : memref<20x32xf32, #tpu.memory_space<vmem>>, vector<16x32xf32>
    tpu.vector_store %arg4[%c2, %c0_5], %4 {strides = array<i32>} : memref<20x32xf32, #tpu.memory_space<vmem>>, vector<16x32xf32>,
    %6 = vector.extract_strided_slice %4 {offsets = [0, 0], sizes = [1, 32], strides = [1, 1]} : vector<16x32xf32> to vector<1x32xf32>
    %7 = vector.shape_cast %6 : vector<1x32xf32> to vector<1x32xf32>
    %8 = vector.broadcast %7 : vector<1x32xf32> to vector<2x32xf32>
    %c0_6 = arith.constant 0 : index
    %c0_7 = arith.constant 0 : index
    %9 = vector.load %arg4[%c0_6, %c0_7] : memref<20x32xf32, #tpu.memory_space<vmem>>, vector<2x32xf32>
    tpu.vector_store %arg4[%c0_6, %c0_7], %8 {strides = array<i32>} : memref<20x32xf32, #tpu.memory_space<vmem>>, vector<2x32xf32>,
    %10 = vector.extract_strided_slice %4 {offsets = [15, 0], sizes = [1, 32], strides = [1, 1]} : vector<16x32xf32> to vector<1x32xf32>
    %11 = vector.shape_cast %10 : vector<1x32xf32> to vector<1x32xf32>
    %12 = vector.broadcast %11 : vector<1x32xf32> to vector<2x32xf32>
    %c18 = arith.constant 18 : index
    %c0_8 = arith.constant 0 : index
    %13 = vector.load %arg4[%c18, %c0_8] : memref<20x32xf32, #tpu.memory_space<vmem>>, vector<2x32xf32>
    tpu.vector_store %arg4[%c18, %c0_8], %12 {strides = array<i32>} : memref<20x32xf32, #tpu.memory_space<vmem>>, vector<2x32xf32>,
    %cst = arith.constant 0.000000e+00 : f32
    %14 = vector.broadcast %cst : f32 to vector<16x32xf32>
    %c0_9 = arith.constant 0 : index
    %c0_10 = arith.constant 0 : index
    %15 = vector.load %arg4[%c0_9, %c0_10] : memref<20x32xf32, #tpu.memory_space<vmem>>, vector<16x32xf32>
    %16 = arith.addf %14, %15 : vector<16x32xf32>
    %c1 = arith.constant 1 : index
    %c0_11 = arith.constant 0 : index
    %17 = vector.load %arg4[%c1, %c0_11] : memref<20x32xf32, #tpu.memory_space<vmem>>, vector<16x32xf32>
    %18 = arith.addf %16, %17 : vector<16x32xf32>
    %c2_12 = arith.constant 2 : index
    %c0_13 = arith.constant 0 : index
    %19 = vector.load %arg4[%c2_12, %c0_13] : memref<20x32xf32, #tpu.memory_space<vmem>>, vector<16x32xf32>
    %20 = arith.addf %18, %19 : vector<16x32xf32>
    %c3 = arith.constant 3 : index
    %c0_14 = arith.constant 0 : index
    %21 = vector.load %arg4[%c3, %c0_14] : memref<20x32xf32, #tpu.memory_space<vmem>>, vector<16x32xf32>
    %22 = arith.addf %20, %21 : vector<16x32xf32>
    %c4 = arith.constant 4 : index
    %c0_15 = arith.constant 0 : index
    %23 = vector.load %arg4[%c4, %c0_15] : memref<20x32xf32, #tpu.memory_space<vmem>>, vector<16x32xf32>
    %24 = arith.addf %22, %23 : vector<16x32xf32>
    %cst_16 = arith.constant 2.000000e-01 : f32
    %25 = vector.broadcast %cst_16 : f32 to vector<16x32xf32>
    %26 = arith.mulf %24, %25 : vector<16x32xf32>
    %27 = arith.subf %4, %26 : vector<16x32xf32>
    %c0_17 = arith.constant 0 : index
    %c0_18 = arith.constant 0 : index
    %c0_19 = arith.constant 0 : index
    %28 = vector.load %arg3[%c0_17, %c0_18, %c0_19] : memref<1x16x32xf32, #tpu.memory_space<vmem>>, vector<1x16x32xf32>
    %29 = vector.shape_cast %28 : vector<1x16x32xf32> to vector<16x32xf32>
    %30 = vector.shape_cast %27 : vector<16x32xf32> to vector<1x16x32xf32>
    tpu.vector_store %arg3[%c0_17, %c0_18, %c0_19], %30 {strides = array<i32>} : memref<1x16x32xf32, #tpu.memory_space<vmem>>, vector<1x16x32xf32>,
    return
  }
  func.func @transform_0(%arg0: i32) -> (i32, i32, i32) {
    %c0_i32 = arith.constant 0 : i32
    %c0_i32_0 = arith.constant 0 : i32
    %c0_i32_1 = arith.constant 0 : i32
    return %arg0, %c0_i32, %c0_i32_0 : i32, i32, i32
  }
  func.func @transform_1(%arg0: i32) -> (i32, i32, i32) {
    %c0_i32 = arith.constant 0 : i32
    %c0_i32_0 = arith.constant 0 : i32
    %c0_i32_1 = arith.constant 0 : i32
    return %arg0, %c0_i32, %c0_i32_0 : i32, i32, i32
  }
  func.func @transform_2(%arg0: i32) -> (i32, i32, i32) {
    %c0_i32 = arith.constant 0 : i32
    %c0_i32_0 = arith.constant 0 : i32
    %c0_i32_1 = arith.constant 0 : i32
    return %arg0, %c0_i32, %c0_i32_0 : i32, i32, i32
  }
}

module attributes {stable_mosaic.version = 11 : i64} {
  func.func @_matmul_kernel(%arg0: i32, %arg1: i32, %arg2: i32, %arg3: memref<32x128xf32, #tpu.memory_space<vmem>>, %arg4: memref<128x128xf32, #tpu.memory_space<vmem>>, %arg5: memref<32x128xf32, #tpu.memory_space<vmem>>, %arg6: memref<32x128xf32, #tpu.memory_space<vmem>>) attributes {dimension_semantics = [#tpu.dimension_semantics<parallel>, #tpu.dimension_semantics<parallel>, #tpu.dimension_semantics<arbitrary>], iteration_bounds = array<i64: 1, 1, 1>, scalar_prefetch = 0 : i64, scratch_operands = 1 : i64, tpu.core_type = #tpu.core_type<tc>, window_params = [{transform_indices = @transform_0, window_bounds = array<i64: 32, 128>}, {transform_indices = @transform_1, window_bounds = array<i64: 128, 128>}, {transform_indices = @transform_2, window_bounds = array<i64: 32, 128>}]} {
    %c0_i32 = arith.constant 0 : i32
    %0 = arith.cmpi eq, %arg2, %c0_i32 : i32
    %1 = arith.extui %0 : i1 to i32
    %c0_i32_0 = arith.constant 0 : i32
    %2 = arith.cmpi ne, %1, %c0_i32_0 : i32
    scf.if %2 {
      %cst_10 = arith.constant 0.000000e+00 : f32
      %12 = vector.broadcast %cst_10 : f32 to vector<32x128xf32>
      %c0_11 = arith.constant 0 : index
      %c0_12 = arith.constant 0 : index
      %13 = vector.load %arg6[%c0_11, %c0_12] : memref<32x128xf32, #tpu.memory_space<vmem>>, vector<32x128xf32>
      tpu.vector_store %arg6[%c0_11, %c0_12], %12 {strides = array<i32>} : memref<32x128xf32, #tpu.memory_space<vmem>>, vector<32x128xf32>,
    } else {
    }
    %c0 = arith.constant 0 : index
    %c0_1 = arith.constant 0 : index
    %3 = vector.load %arg6[%c0, %c0_1] : memref<32x128xf32, #tpu.memory_space<vmem>>, vector<32x128xf32>
    %c0_2 = arith.constant 0 : index
    %c0_3 = arith.constant 0 : index
    %4 = vector.load %arg3[%c0_2, %c0_3] : memref<32x128xf32, #tpu.memory_space<vmem>>, vector<32x128xf32>
    %c0_4 = arith.constant 0 : index
    %c0_5 = arith.constant 0 : index
    %5 = vector.load %arg4[%c0_4, %c0_5] : memref<128x128xf32, #tpu.memory_space<vmem>>, vector<128x128xf32>
    %cst = arith.constant dense<0.000000e+00> : vector<32x128xf32>
    %6 = tpu.matmul %4, %5, %cst {dimension_numbers = #tpu.dot_dimension_numbers<[1], [0], [0], [1], [0, 0, 1, 1], [], []>} : vector<32x128xf32>, vector<128x128xf32>, vector<32x128xf32> -> vector<32x128xf32>
    %7 = arith.addf %3, %6 : vector<32x128xf32>
    %c0_6 = arith.constant 0 : index
    %c0_7 = arith.constant 0 : index
    %8 = vector.load %arg6[%c0_6, %c0_7] : memref<32x128xf32, #tpu.memory_space<vmem>>, vector<32x128xf32>
    tpu.vector_store %arg6[%c0_6, %c0_7], %7 {strides = array<i32>} : memref<32x128xf32, #tpu.memory_space<vmem>>, vector<32x128xf32>,
    %c0_i32_8 = arith.constant 0 : i32
    %9 = arith.cmpi eq, %arg2, %c0_i32_8 : i32
    %10 = arith.extui %9 : i1 to i32
    %c0_i32_9 = arith.constant 0 : i32
    %11 = arith.cmpi ne, %10, %c0_i32_9 : i32
    scf.if %11 {
      %c0_10 = arith.constant 0 : index
      %c0_11 = arith.constant 0 : index
      %12 = vector.load %arg6[%c0_10, %c0_11] : memref<32x128xf32, #tpu.memory_space<vmem>>, vector<32x128xf32>
      %c0_12 = arith.constant 0 : index
      %c0_13 = arith.constant 0 : index
      %13 = vector.load %arg5[%c0_12, %c0_13] : memref<32x128xf32, #tpu.memory_space<vmem>>, vector<32x128xf32>
      tpu.vector_store %arg5[%c0_12, %c0_13], %12 {strides = array<i32>} : memref<32x128xf32, #tpu.memory_space<vmem>>, vector<32x128xf32>,
    } else {
    }
    return
  }
  func.func @transform_0(%arg0: i32, %arg1: i32, %arg2: i32) -> (i32, i32) {
    %c0_i32 = arith.constant 0 : i32
    return %arg0, %arg2 : i32, i32
  }
  func.func @transform_1(%arg0: i32, %arg1: i32, %arg2: i32) -> (i32, i32) {
    %c0_i32 = arith.constant 0 : i32
    return %arg2, %arg1 : i32, i32
  }
  func.func @transform_2(%arg0: i32, %arg1: i32, %arg2: i32) -> (i32, i32) {
    %c0_i32 = arith.constant 0 : i32
    return %arg0, %arg1 : i32, i32
  }
}

module attributes {stable_mosaic.version = 11 : i64} {
  func.func @_layernorm_kernel(%arg0: i32, %arg1: memref<1x16x32xf32, #tpu.memory_space<vmem>>, %arg2: memref<1x32xf32, #tpu.memory_space<vmem>>, %arg3: memref<1x32xf32, #tpu.memory_space<vmem>>, %arg4: memref<1x16x32xf32, #tpu.memory_space<vmem>>) attributes {dimension_semantics = [#tpu.dimension_semantics<parallel>], iteration_bounds = array<i64: 2>, scalar_prefetch = 0 : i64, scratch_operands = 0 : i64, tpu.core_type = #tpu.core_type<tc>, window_params = [{transform_indices = @transform_0, window_bounds = array<i64: 1, 16, 32>}, {pipeline_mode = #tpu.pipeline_mode<synchronous>, transform_indices = @transform_1, window_bounds = array<i64: 1, 32>}, {pipeline_mode = #tpu.pipeline_mode<synchronous>, transform_indices = @transform_2, window_bounds = array<i64: 1, 32>}, {transform_indices = @transform_3, window_bounds = array<i64: 1, 16, 32>}]} {
    %c0 = arith.constant 0 : index
    %c0_0 = arith.constant 0 : index
    %c0_1 = arith.constant 0 : index
    %0 = vector.load %arg1[%c0, %c0_0, %c0_1] : memref<1x16x32xf32, #tpu.memory_space<vmem>>, vector<1x16x32xf32>
    %1 = vector.shape_cast %0 : vector<1x16x32xf32> to vector<16x32xf32>
    %cst = arith.constant dense<0.000000e+00> : vector<16xf32>
    %2 = vector.multi_reduction <add>, %1, %cst [1] : vector<16x32xf32> to vector<16xf32>
    %3 = vector.shape_cast %2 : vector<16xf32> to vector<16x1xf32>
    %cst_2 = arith.constant 3.200000e+01 : f32
    %4 = vector.broadcast %cst_2 : f32 to vector<16x1xf32>
    %5 = arith.divf %3, %4 : vector<16x1xf32>
    %6 = vector.broadcast %5 : vector<16x1xf32> to vector<16x32xf32>
    %7 = arith.subf %1, %6 : vector<16x32xf32>
    %8 = arith.mulf %7, %7 : vector<16x32xf32>
    %cst_3 = arith.constant dense<0.000000e+00> : vector<16xf32>
    %9 = vector.multi_reduction <add>, %8, %cst_3 [1] : vector<16x32xf32> to vector<16xf32>
    %10 = vector.shape_cast %9 : vector<16xf32> to vector<16x1xf32>
    %cst_4 = arith.constant 3.200000e+01 : f32
    %11 = vector.broadcast %cst_4 : f32 to vector<16x1xf32>
    %12 = arith.divf %10, %11 : vector<16x1xf32>
    %13 = vector.broadcast %5 : vector<16x1xf32> to vector<16x32xf32>
    %14 = arith.subf %1, %13 : vector<16x32xf32>
    %cst_5 = arith.constant 9.99999974E-6 : f32
    %15 = vector.broadcast %cst_5 : f32 to vector<16x1xf32>
    %16 = arith.addf %12, %15 : vector<16x1xf32>
    %17 = math.rsqrt %16 : vector<16x1xf32>
    %18 = vector.broadcast %17 : vector<16x1xf32> to vector<16x32xf32>
    %19 = arith.mulf %14, %18 : vector<16x32xf32>
    %c0_6 = arith.constant 0 : index
    %c0_7 = arith.constant 0 : index
    %20 = vector.load %arg2[%c0_6, %c0_7] : memref<1x32xf32, #tpu.memory_space<vmem>>, vector<1x32xf32>
    %21 = vector.broadcast %20 : vector<1x32xf32> to vector<16x32xf32>
    %22 = arith.mulf %19, %21 : vector<16x32xf32>
    %c0_8 = arith.constant 0 : index
    %c0_9 = arith.constant 0 : index
    %23 = vector.load %arg3[%c0_8, %c0_9] : memref<1x32xf32, #tpu.memory_space<vmem>>, vector<1x32xf32>
    %24 = vector.broadcast %23 : vector<1x32xf32> to vector<16x32xf32>
    %25 = arith.addf %22, %24 : vector<16x32xf32>
    %cst_10 = arith.constant dense<0.000000e+00> : vector<32xf32>
    %26 = vector.multi_reduction <add>, %25, %cst_10 [0] : vector<16x32xf32> to vector<32xf32>
    %27 = vector.shape_cast %26 : vector<32xf32> to vector<1x32xf32>
    %cst_11 = arith.constant 1.600000e+01 : f32
    %28 = vector.broadcast %cst_11 : f32 to vector<1x32xf32>
    %29 = arith.divf %27, %28 : vector<1x32xf32>
    %30 = vector.broadcast %29 : vector<1x32xf32> to vector<16x32xf32>
    %31 = arith.subf %25, %30 : vector<16x32xf32>
    %c0_12 = arith.constant 0 : index
    %c0_13 = arith.constant 0 : index
    %c0_14 = arith.constant 0 : index
    %32 = vector.load %arg4[%c0_12, %c0_13, %c0_14] : memref<1x16x32xf32, #tpu.memory_space<vmem>>, vector<1x16x32xf32>
    %33 = vector.shape_cast %32 : vector<1x16x32xf32> to vector<16x32xf32>
    %34 = vector.shape_cast %31 : vector<16x32xf32> to vector<1x16x32xf32>
    tpu.vector_store %arg4[%c0_12, %c0_13, %c0_14], %34 {strides = array<i32>} : memref<1x16x32xf32, #tpu.memory_space<vmem>>, vector<1x16x32xf32>,
    return
  }
  func.func @transform_0(%arg0: i32) -> (i32, i32, i32) {
    %c0_i32 = arith.constant 0 : i32
    %c0_i32_0 = arith.constant 0 : i32
    %c0_i32_1 = arith.constant 0 : i32
    return %arg0, %c0_i32, %c0_i32_0 : i32, i32, i32
  }
  func.func @transform_1(%arg0: i32) -> (i32, i32) {
    %c0_i32 = arith.constant 0 : i32
    %c0_i32_0 = arith.constant 0 : i32
    %c0_i32_1 = arith.constant 0 : i32
    return %c0_i32, %c0_i32_0 : i32, i32
  }
  func.func @transform_2(%arg0: i32) -> (i32, i32) {
    %c0_i32 = arith.constant 0 : i32
    %c0_i32_0 = arith.constant 0 : i32
    %c0_i32_1 = arith.constant 0 : i32
    return %c0_i32, %c0_i32_0 : i32, i32
  }
  func.func @transform_3(%arg0: i32) -> (i32, i32, i32) {
    %c0_i32 = arith.constant 0 : i32
    %c0_i32_0 = arith.constant 0 : i32
    %c0_i32_1 = arith.constant 0 : i32
    return %arg0, %c0_i32, %c0_i32_0 : i32, i32, i32
  }
}

</mosaic_0001>

<bundles_post_ra>
// kernel: reverse.5
= control target key start
LH: loop header
LB: loop body
LE: loop exit
PB: predicated region body
PF: predicated region fallthrough
CT: control target
= control target key end

     0   :  { %v40_v2 = vld [vmem:[#allocation0 + $0x7] ss:$-1 sm:$0xff]  ;;  %v47_v3 = vlaneseq  ;;  %v54_v5 = vld [vmem:[#allocation0 + $0x17] ss:$-1 sm:$0xff]  ;;  %s135_s0 = inlined_call_operand.vmem [shape: f32[2,32,7], index: 0, kind: input, shape index: {}]   ;;  %s136_s1 = inlined_call_operand.vmem [shape: f32[2,32,7], index: 1, kind: output, shape index: {}]  }
   0x1   :  { %v32_v0 = vld [vmem:[%s135_s0] sm:$0xff]  ;;  %v34_v1 = vld [vmem:[%s135_s0 + $0x8] sm:$0xff]  ;;  %v41_v4 = vrot.slane %v40_v2, 1  ;;  %v55_v6 = vrot.slane %v54_v5, 1 }
   0x2   :  { %33 = vst [vmem:[#allocation0 + $0x8] sm:$0xff] %v32_v0  ;;  %35 = vst [vmem:[#allocation0 + $0x18] sm:$0xff] %v34_v1  ;;  %v48_v7 = vshrl.u32 %v47_v3, 7 }
   0x3   :  { %42 = vst [vmem:[#allocation1] sm:$0xff] %v41_v4  ;;  %56 = vst [vmem:[#allocation1 + $0x8] sm:$0xff] %v55_v6 }
   0x4   :  { %vm49_vm0 = vcmp.lt.s32.totalorder %v48_v7, 7 }
   0x9   :  { %v45_v8 = vld [vmem:[#allocation0 + $0xf] ss:$-1 sm:$0xff]  ;;  %v59_v9 = vld [vmem:[#allocation0 + $0x1f] ss:$-1 sm:$0xff] }
   0xa   :  { %v46_v10 = vrot.slane %v45_v8, 1  ;;  %v60_v11 = vrot.slane %v59_v9, 1 }
   0xc   :  { %50 = vst.msk [vmem:[#allocation1] sm:$0xff] %vm49_vm0, %v46_v10  ;;  %64 = vst.msk [vmem:[#allocation1 + $0x8] sm:$0xff] %vm49_vm0, %v60_v11 }
  0x13   :  { %v94_v12 = vld [vmem:[#allocation1] sm:$0xff]  ;;  %v96_v13 = vld [vmem:[#allocation1 + $0x8] sm:$0xff] }
  0x14   :  { %95 = vst [vmem:[%s136_s1] sm:$0xff] %v94_v12  ;;  %97 = vst [vmem:[%s136_s1 + $0x8] sm:$0xff] %v96_v13 }

// kernel: _lambda_.13
= control target key start
LH: loop header
LB: loop body
LE: loop exit
PB: predicated region body
PF: predicated region fallthrough
CT: control target
= control target key end

     0   :  { %8 = vsyncpa [#allocation4], 0  ;;  %s314_s12 = smov [#allocation3]   ;;  %s376_s0 = inlined_call_operand.vmem [shape: f32[32,128], index: 0, kind: input, shape index: {}]   ;;  %s377_s1 = inlined_call_operand.hbm [shape: f32[128,128], index: 1, kind: input, shape index: {}]   ;;  %s378_s2 = inlined_call_operand.vmem [shape: f32[1,128], index: 2, kind: input, shape index: {}]   ;;  %s379_s3 = inlined_call_operand.vmem [shape: f32[32,128], index: 3, kind: output, shape index: {}]  }
   0x1   :  { %s16_s13 = sshll.u32 %s314_s12, 4  ;;  %s290_s16 = scalar_lea.hbm %s377_s1, 2048  ;;  %s17_s13 = int_to_ptr.vmem [resolvable:$true] %s16_s13 }
   0x2   :  { %p291_p0 = scmp.ne.s32.totalorder %s377_s1, %s290_s16  ;;  %p294_p1 = scmp.lt.u32.totalorder %s290_s16, %s377_s1 }
   0x4   :  { %p296_p2 = pnand %p294_p1, %p291_p0 }
   0x6   :  { %299 = shalt.err (!%p296_p2)
}
   0x7   :  { %s300_s21 = scalar_lea.vmem %s17_s13, 2048  ;;  %p305_p4 = scmp.lt.s32.totalorder %s17_s13, %s17_s13 }
   0x8   :  { %p301_p3 = scmp.ne.s32.totalorder %s17_s13, %s300_s21  ;;  %p306_p5 = scmp.lt.s32.totalorder %s300_s21, %s300_s21 }
   0xa   :  { %p307_p6 = por %p306_p5, %p305_p4 }
   0xc   :  { %p308_p7 = pnand %p307_p6, %p301_p3 }
   0xe   :  { %311 = shalt.err (!%p308_p7)
}
   0xf   :  { %s315_s22 = smov 128   ;;  %s316_s23 = smov 8  }
  0x10   :  { %22 = dma.hbm_to_vmem [thread:$0]  %s377_s1, 2048, %s17_s13, [#allocation4], %s315_s22, %s315_s22, %s316_s23  }
  0x11   :  { %312 = dma.done.wait [#allocation4], 2048  }
  0x12   :  { %313 = vsyncadd [#allocation4], 4294965248  ;;  %v44_v0 = vld [vmem:[#allocation3] sm:$0xff]  ;;  %v45_v1 = vld [vmem:[#allocation3 + $0x8] sm:$0xff] }
  0x13   :  { %v46_v2 = vld [vmem:[#allocation3 + $0x10] sm:$0xff]  ;;  %v239_v3 = vpack.c.bf16 %v45_v1, %v44_v0  ;;  %v47_v4 = vld [vmem:[#allocation3 + $0x18] sm:$0xff]  ;;  %v48_v6 = vld [vmem:[#allocation3 + $0x20] sm:$0xff] }
  0x14   :  { %v243_v5 = vpack.c.bf16 %v47_v4, %v46_v2  ;;  %v49_v7 = vld [vmem:[#allocation3 + $0x28] sm:$0xff]  ;;  %v40_v9 = vld [vmem:[%s376_s0] sm:$0xff]  ;;  %v42_v10 = vld [vmem:[%s376_s0 + $0x10] sm:$0xff] }
  0x15   :  { %240 = vmatprep.subr.bf16.mxu0 %v239_v3  ;;  %271 = vmatprep.subr.bf16.mxu1 %v239_v3  ;;  %v247_v8 = vpack.c.bf16 %v49_v7, %v48_v6  ;;  %v50_v11 = vld [vmem:[#allocation3 + $0x30] sm:$0xff]  ;;  %v51_v12 = vld [vmem:[#allocation3 + $0x38] sm:$0xff]  ;;  %v52_v14 = vld [vmem:[#allocation3 + $0x40] sm:$0xff] }
  0x16   :  { %242 = vmatpush3.bf16.msra.mxu0 %v239_v3  ;;  %279 = vmatpush3.bf16.msra.mxu1 %v239_v3  ;;  %v251_v13 = vpack.c.bf16 %v51_v12, %v50_v11  ;;  %v53_v15 = vld [vmem:[#allocation3 + $0x48] sm:$0xff]  ;;  %v54_v17 = vld [vmem:[#allocation3 + $0x50] sm:$0xff]  ;;  %v55_v18 = vld [vmem:[#allocation3 + $0x58] sm:$0xff] }
  0x17   :  { %244 = vmatprep.subr.bf16.mxu0 %v243_v5  ;;  %272 = vmatprep.subr.bf16.mxu1 %v243_v5  ;;  %v255_v16 = vpack.c.bf16 %v53_v15, %v52_v14  ;;  %v259_v19 = vpack.c.bf16 %v55_v18, %v54_v17  ;;  %v56_v20 = vld [vmem:[#allocation3 + $0x60] sm:$0xff]  ;;  %v57_v21 = vld [vmem:[#allocation3 + $0x68] sm:$0xff]  ;;  %v58_v23 = vld [vmem:[#allocation3 + $0x70] sm:$0xff] }
  0x18   :  { %233 = vmatprep.mubr.f32.mxu0 %v40_v9  ;;  %236 = vmatprep.mubr.f32.mxu1 %v42_v10  ;;  %v263_v22 = vpack.c.bf16 %v57_v21, %v56_v20  ;;  %v59_v24 = vld [vmem:[#allocation3 + $0x78] sm:$0xff]  ;;  %v41_v26 = vld [vmem:[%s376_s0 + $0x8] sm:$0xff]  ;;  %v180_v28 = vld [vmem:[%s378_s2] ss:$0 sm:$0xff] }
  0x19   :  { %v267_v25 = vpack.c.bf16 %v59_v24, %v58_v23  ;;  %v43_v27 = vld [vmem:[%s376_s0 + $0x18] sm:$0xff] }
  0x1a   :  { %246 = vmatpush3.bf16.msra.mxu0 %v243_v5  ;;  %280 = vmatpush3.bf16.msra.mxu1 %v243_v5 }
  0x1b   :  { %248 = vmatprep.subr.bf16.mxu0 %v247_v8  ;;  %273 = vmatprep.subr.bf16.mxu1 %v247_v8 }
  0x1e   :  { %250 = vmatpush3.bf16.msra.mxu0 %v247_v8  ;;  %281 = vmatpush3.bf16.msra.mxu1 %v247_v8 }
  0x1f   :  { %252 = vmatprep.subr.bf16.mxu0 %v251_v13  ;;  %274 = vmatprep.subr.bf16.mxu1 %v251_v13 }
  0x22   :  { %254 = vmatpush3.bf16.msra.mxu0 %v251_v13  ;;  %282 = vmatpush3.bf16.msra.mxu1 %v251_v13 }
  0x23   :  { %256 = vmatprep.subr.bf16.mxu0 %v255_v16  ;;  %275 = vmatprep.subr.bf16.mxu1 %v255_v16 }
  0x26   :  { %258 = vmatpush3.bf16.msra.mxu0 %v255_v16  ;;  %283 = vmatpush3.bf16.msra.mxu1 %v255_v16 }
  0x27   :  { %260 = vmatprep.subr.bf16.mxu0 %v259_v19  ;;  %276 = vmatprep.subr.bf16.mxu1 %v259_v19 }
  0x2a   :  { %262 = vmatpush3.bf16.msra.mxu0 %v259_v19  ;;  %284 = vmatpush3.bf16.msra.mxu1 %v259_v19 }
  0x2b   :  { %264 = vmatprep.subr.bf16.mxu0 %v263_v22  ;;  %277 = vmatprep.subr.bf16.mxu1 %v263_v22 }
  0x2e   :  { %266 = vmatpush3.bf16.msra.mxu0 %v263_v22  ;;  %285 = vmatpush3.bf16.msra.mxu1 %v263_v22 }
  0x2f   :  { %268 = vmatprep.subr.bf16.mxu0 %v267_v25  ;;  %278 = vmatprep.subr.bf16.mxu1 %v267_v25 }
  0x32   :  { %270 = vmatpush3.bf16.msra.mxu0 %v267_v25  ;;  %286 = vmatpush3.bf16.msra.mxu1 %v267_v25 }
  0x35   :  { %234 = vmatmul.mubr.f32.vlgmr.msra.gmra.mrb[0].mxu0 %v41_v26  ;;  %237 = vmatmul.mubr.f32.vlgmr.msra.gmra.mrb[0].mxu1 %v43_v27 }
 0x108   :  { %v235_v29 = vpop.f32.mrb[0].mxu0  ;;  %v238_v30 = vpop.f32.mrb[0].mxu1 }
 0x109   :  { %v168_v31 = vadd.f32 %v235_v29, %v180_v28  ;;  %v170_v32 = vadd.f32 %v238_v30, %v180_v28  ;;  %v126_v33 = vpop.f32.mrb[1].mxu0  ;;  %v136_v34 = vpop.f32.mrb[1].mxu1 }
 0x10a   :  { %v167_v35 = vadd.f32 %v180_v28, %v126_v33  ;;  %v169_v36 = vadd.f32 %v180_v28, %v136_v34 }
 0x10b   :  { %172 = vst [vmem:[%s379_s3 + $0x8] sm:$0xff] %v168_v31  ;;  %174 = vst [vmem:[%s379_s3 + $0x18] sm:$0xff] %v170_v32 }
 0x10c   :  { %171 = vst [vmem:[%s379_s3] sm:$0xff] %v167_v35  ;;  %173 = vst [vmem:[%s379_s3 + $0x10] sm:$0xff] %v169_v36 }
 0x10d   :  { %179 = vsyncpa [#allocation4], 1 }

// kernel: _lambda_.16
= control target key start
LH: loop header
LB: loop body
LE: loop exit
PB: predicated region body
PF: predicated region fallthrough
CT: control target
= control target key end

     0   :  { %s348_s1 = inlined_call_operand.vmem [shape: f32[128,128], index: 1, kind: input, shape index: {}]   ;;  %s349_s0 = inlined_call_operand.vmem [shape: f32[32,128], index: 0, kind: input, shape index: {}]   ;;  %s350_s2 = inlined_call_operand.vmem [shape: f32[32,128], index: 2, kind: output, shape index: {}]  }
   0x1   :  { %v27_v0 = vld [vmem:[%s348_s1] sm:$0xff]  ;;  %v28_v1 = vld [vmem:[%s348_s1 + $0x8] sm:$0xff]  ;;  %v29_v2 = vld [vmem:[%s348_s1 + $0x10] sm:$0xff] }
   0x2   :  { %v213_v3 = vpack.c.bf16 %v28_v1, %v27_v0  ;;  %v30_v4 = vld [vmem:[%s348_s1 + $0x18] sm:$0xff]  ;;  %v31_v6 = vld [vmem:[%s348_s1 + $0x20] sm:$0xff]  ;;  %v32_v7 = vld [vmem:[%s348_s1 + $0x28] sm:$0xff] }
   0x3   :  { %v217_v5 = vpack.c.bf16 %v30_v4, %v29_v2  ;;  %v221_v8 = vpack.c.bf16 %v32_v7, %v31_v6  ;;  %v23_v9 = vld [vmem:[%s349_s0] sm:$0xff]  ;;  %v25_v10 = vld [vmem:[%s349_s0 + $0x10] sm:$0xff]  ;;  %v34_v12 = vld [vmem:[%s348_s1 + $0x38] sm:$0xff] }
   0x4   :  { %214 = vmatprep.subr.bf16.mxu0 %v213_v3  ;;  %245 = vmatprep.subr.bf16.mxu1 %v213_v3  ;;  %v33_v11 = vld [vmem:[%s348_s1 + $0x30] sm:$0xff]  ;;  %v35_v14 = vld [vmem:[%s348_s1 + $0x40] sm:$0xff]  ;;  %v36_v15 = vld [vmem:[%s348_s1 + $0x48] sm:$0xff] }
   0x5   :  { %216 = vmatpush3.bf16.msra.mxu0 %v213_v3  ;;  %253 = vmatpush3.bf16.msra.mxu1 %v213_v3  ;;  %v225_v13 = vpack.c.bf16 %v34_v12, %v33_v11  ;;  %v229_v16 = vpack.c.bf16 %v36_v15, %v35_v14  ;;  %v37_v17 = vld [vmem:[%s348_s1 + $0x50] sm:$0xff]  ;;  %v38_v18 = vld [vmem:[%s348_s1 + $0x58] sm:$0xff]  ;;  %v39_v20 = vld [vmem:[%s348_s1 + $0x60] sm:$0xff] }
   0x6   :  { %218 = vmatprep.subr.bf16.mxu0 %v217_v5  ;;  %246 = vmatprep.subr.bf16.mxu1 %v217_v5  ;;  %v233_v19 = vpack.c.bf16 %v38_v18, %v37_v17  ;;  %v40_v21 = vld [vmem:[%s348_s1 + $0x68] sm:$0xff]  ;;  %v41_v23 = vld [vmem:[%s348_s1 + $0x70] sm:$0xff]  ;;  %v42_v24 = vld [vmem:[%s348_s1 + $0x78] sm:$0xff] }
   0x7   :  { %207 = vmatprep.mubr.f32.mxu0 %v23_v9  ;;  %210 = vmatprep.mubr.f32.mxu1 %v25_v10  ;;  %v237_v22 = vpack.c.bf16 %v40_v21, %v39_v20  ;;  %v241_v25 = vpack.c.bf16 %v42_v24, %v41_v23  ;;  %v24_v26 = vld [vmem:[%s349_s0 + $0x8] sm:$0xff]  ;;  %v26_v27 = vld [vmem:[%s349_s0 + $0x18] sm:$0xff] }
   0x9   :  { %220 = vmatpush3.bf16.msra.mxu0 %v217_v5  ;;  %254 = vmatpush3.bf16.msra.mxu1 %v217_v5 }
   0xa   :  { %222 = vmatprep.subr.bf16.mxu0 %v221_v8  ;;  %247 = vmatprep.subr.bf16.mxu1 %v221_v8 }
   0xd   :  { %224 = vmatpush3.bf16.msra.mxu0 %v221_v8  ;;  %255 = vmatpush3.bf16.msra.mxu1 %v221_v8 }
   0xe   :  { %226 = vmatprep.subr.bf16.mxu0 %v225_v13  ;;  %248 = vmatprep.subr.bf16.mxu1 %v225_v13 }
  0x11   :  { %228 = vmatpush3.bf16.msra.mxu0 %v225_v13  ;;  %256 = vmatpush3.bf16.msra.mxu1 %v225_v13 }
  0x12   :  { %230 = vmatprep.subr.bf16.mxu0 %v229_v16  ;;  %249 = vmatprep.subr.bf16.mxu1 %v229_v16 }
  0x15   :  { %232 = vmatpush3.bf16.msra.mxu0 %v229_v16  ;;  %257 = vmatpush3.bf16.msra.mxu1 %v229_v16 }
  0x16   :  { %234 = vmatprep.subr.bf16.mxu0 %v233_v19  ;;  %250 = vmatprep.subr.bf16.mxu1 %v233_v19 }
  0x19   :  { %236 = vmatpush3.bf16.msra.mxu0 %v233_v19  ;;  %258 = vmatpush3.bf16.msra.mxu1 %v233_v19 }
  0x1a   :  { %238 = vmatprep.subr.bf16.mxu0 %v237_v22  ;;  %251 = vmatprep.subr.bf16.mxu1 %v237_v22 }
  0x1d   :  { %240 = vmatpush3.bf16.msra.mxu0 %v237_v22  ;;  %259 = vmatpush3.bf16.msra.mxu1 %v237_v22 }
  0x1e   :  { %242 = vmatprep.subr.bf16.mxu0 %v241_v25  ;;  %252 = vmatprep.subr.bf16.mxu1 %v241_v25 }
  0x21   :  { %244 = vmatpush3.bf16.msra.mxu0 %v241_v25  ;;  %260 = vmatpush3.bf16.msra.mxu1 %v241_v25 }
  0x24   :  { %208 = vmatmul.mubr.f32.vlgmr.msra.gmra.mrb[0].mxu0 %v24_v26  ;;  %211 = vmatmul.mubr.f32.vlgmr.msra.gmra.mrb[0].mxu1 %v26_v27 }
  0xf7   :  { %v209_v28 = vpop.f32.mrb[0].mxu0  ;;  %v212_v29 = vpop.f32.mrb[0].mxu1 }
  0xf8   :  { %v144_v30 = vmax.f32 %v209_v28, 0.0  ;;  %v146_v31 = vmax.f32 %v212_v29, 0.0  ;;  %v109_v32 = vpop.f32.mrb[1].mxu0  ;;  %v119_v33 = vpop.f32.mrb[1].mxu1 }
  0xf9   :  { %v143_v34 = vmax.f32 %v109_v32, 0.0  ;;  %v145_v35 = vmax.f32 %v119_v33, 0.0 }
  0xfa   :  { %148 = vst [vmem:[%s350_s2 + $0x8] sm:$0xff] %v144_v30  ;;  %150 = vst [vmem:[%s350_s2 + $0x18] sm:$0xff] %v146_v31 }
  0xfb   :  { %147 = vst [vmem:[%s350_s2] sm:$0xff] %v143_v34  ;;  %149 = vst [vmem:[%s350_s2 + $0x10] sm:$0xff] %v145_v35 }

// kernel: _lambda_.14
= control target key start
LH: loop header
LB: loop body
LE: loop exit
PB: predicated region body
PF: predicated region fallthrough
CT: control target
= control target key end

     0   :  { %s367_s1 = inlined_call_operand.vmem [shape: f32[128,128], index: 1, kind: input, shape index: {}]   ;;  %s368_s0 = inlined_call_operand.vmem [shape: f32[32,128], index: 0, kind: input, shape index: {}]   ;;  %s369_s2 = inlined_call_operand.vmem [shape: f32[1,128], index: 2, kind: input, shape index: {}]   ;;  %s370_s3 = inlined_call_operand.vmem [shape: f32[32,128], index: 3, kind: output, shape index: {}]  }
   0x1   :  { %v30_v0 = vld [vmem:[%s367_s1] sm:$0xff]  ;;  %v31_v1 = vld [vmem:[%s367_s1 + $0x8] sm:$0xff]  ;;  %v32_v2 = vld [vmem:[%s367_s1 + $0x10] sm:$0xff] }
   0x2   :  { %v224_v3 = vpack.c.bf16 %v31_v1, %v30_v0  ;;  %v33_v4 = vld [vmem:[%s367_s1 + $0x18] sm:$0xff]  ;;  %v34_v6 = vld [vmem:[%s367_s1 + $0x20] sm:$0xff]  ;;  %v35_v7 = vld [vmem:[%s367_s1 + $0x28] sm:$0xff] }
   0x3   :  { %v228_v5 = vpack.c.bf16 %v33_v4, %v32_v2  ;;  %v232_v8 = vpack.c.bf16 %v35_v7, %v34_v6  ;;  %v26_v9 = vld [vmem:[%s368_s0] sm:$0xff]  ;;  %v28_v10 = vld [vmem:[%s368_s0 + $0x10] sm:$0xff]  ;;  %v37_v12 = vld [vmem:[%s367_s1 + $0x38] sm:$0xff] }
   0x4   :  { %225 = vmatprep.subr.bf16.mxu0 %v224_v3  ;;  %256 = vmatprep.subr.bf16.mxu1 %v224_v3  ;;  %v36_v11 = vld [vmem:[%s367_s1 + $0x30] sm:$0xff]  ;;  %v38_v14 = vld [vmem:[%s367_s1 + $0x40] sm:$0xff]  ;;  %v39_v15 = vld [vmem:[%s367_s1 + $0x48] sm:$0xff] }
   0x5   :  { %227 = vmatpush3.bf16.msra.mxu0 %v224_v3  ;;  %264 = vmatpush3.bf16.msra.mxu1 %v224_v3  ;;  %v236_v13 = vpack.c.bf16 %v37_v12, %v36_v11  ;;  %v240_v16 = vpack.c.bf16 %v39_v15, %v38_v14  ;;  %v40_v17 = vld [vmem:[%s367_s1 + $0x50] sm:$0xff]  ;;  %v41_v18 = vld [vmem:[%s367_s1 + $0x58] sm:$0xff]  ;;  %v42_v20 = vld [vmem:[%s367_s1 + $0x60] sm:$0xff] }
   0x6   :  { %229 = vmatprep.subr.bf16.mxu0 %v228_v5  ;;  %257 = vmatprep.subr.bf16.mxu1 %v228_v5  ;;  %v244_v19 = vpack.c.bf16 %v41_v18, %v40_v17  ;;  %v43_v21 = vld [vmem:[%s367_s1 + $0x68] sm:$0xff]  ;;  %v44_v23 = vld [vmem:[%s367_s1 + $0x70] sm:$0xff]  ;;  %v45_v24 = vld [vmem:[%s367_s1 + $0x78] sm:$0xff] }
   0x7   :  { %218 = vmatprep.mubr.f32.mxu0 %v26_v9  ;;  %221 = vmatprep.mubr.f32.mxu1 %v28_v10  ;;  %v248_v22 = vpack.c.bf16 %v43_v21, %v42_v20  ;;  %v252_v25 = vpack.c.bf16 %v45_v24, %v44_v23  ;;  %v27_v26 = vld [vmem:[%s368_s0 + $0x8] sm:$0xff]  ;;  %v29_v27 = vld [vmem:[%s368_s0 + $0x18] sm:$0xff]  ;;  %v165_v28 = vld [vmem:[%s369_s2] ss:$0 sm:$0xff] }
   0x9   :  { %231 = vmatpush3.bf16.msra.mxu0 %v228_v5  ;;  %265 = vmatpush3.bf16.msra.mxu1 %v228_v5 }
   0xa   :  { %233 = vmatprep.subr.bf16.mxu0 %v232_v8  ;;  %258 = vmatprep.subr.bf16.mxu1 %v232_v8 }
   0xd   :  { %235 = vmatpush3.bf16.msra.mxu0 %v232_v8  ;;  %266 = vmatpush3.bf16.msra.mxu1 %v232_v8 }
   0xe   :  { %237 = vmatprep.subr.bf16.mxu0 %v236_v13  ;;  %259 = vmatprep.subr.bf16.mxu1 %v236_v13 }
  0x11   :  { %239 = vmatpush3.bf16.msra.mxu0 %v236_v13  ;;  %267 = vmatpush3.bf16.msra.mxu1 %v236_v13 }
  0x12   :  { %241 = vmatprep.subr.bf16.mxu0 %v240_v16  ;;  %260 = vmatprep.subr.bf16.mxu1 %v240_v16 }
  0x15   :  { %243 = vmatpush3.bf16.msra.mxu0 %v240_v16  ;;  %268 = vmatpush3.bf16.msra.mxu1 %v240_v16 }
  0x16   :  { %245 = vmatprep.subr.bf16.mxu0 %v244_v19  ;;  %261 = vmatprep.subr.bf16.mxu1 %v244_v19 }
  0x19   :  { %247 = vmatpush3.bf16.msra.mxu0 %v244_v19  ;;  %269 = vmatpush3.bf16.msra.mxu1 %v244_v19 }
  0x1a   :  { %249 = vmatprep.subr.bf16.mxu0 %v248_v22  ;;  %262 = vmatprep.subr.bf16.mxu1 %v248_v22 }
  0x1d   :  { %251 = vmatpush3.bf16.msra.mxu0 %v248_v22  ;;  %270 = vmatpush3.bf16.msra.mxu1 %v248_v22 }
  0x1e   :  { %253 = vmatprep.subr.bf16.mxu0 %v252_v25  ;;  %263 = vmatprep.subr.bf16.mxu1 %v252_v25 }
  0x21   :  { %255 = vmatpush3.bf16.msra.mxu0 %v252_v25  ;;  %271 = vmatpush3.bf16.msra.mxu1 %v252_v25 }
  0x24   :  { %219 = vmatmul.mubr.f32.vlgmr.msra.gmra.mrb[0].mxu0 %v27_v26  ;;  %222 = vmatmul.mubr.f32.vlgmr.msra.gmra.mrb[0].mxu1 %v29_v27 }
  0xf7   :  { %v220_v29 = vpop.f32.mrb[0].mxu0  ;;  %v223_v30 = vpop.f32.mrb[0].mxu1 }
  0xf8   :  { %v154_v31 = vadd.f32 %v220_v29, %v165_v28  ;;  %v156_v32 = vadd.f32 %v223_v30, %v165_v28  ;;  %v112_v33 = vpop.f32.mrb[1].mxu0  ;;  %v122_v34 = vpop.f32.mrb[1].mxu1 }
  0xf9   :  { %v153_v35 = vadd.f32 %v165_v28, %v112_v33  ;;  %v155_v36 = vadd.f32 %v165_v28, %v122_v34 }
  0xfa   :  { %158 = vst [vmem:[%s370_s3 + $0x8] sm:$0xff] %v154_v31  ;;  %160 = vst [vmem:[%s370_s3 + $0x18] sm:$0xff] %v156_v32 }
  0xfb   :  { %157 = vst [vmem:[%s370_s3] sm:$0xff] %v153_v35  ;;  %159 = vst [vmem:[%s370_s3 + $0x10] sm:$0xff] %v155_v36 }

// kernel: _lambda_.15
= control target key start
LH: loop header
LB: loop body
LE: loop exit
PB: predicated region body
PF: predicated region fallthrough
CT: control target
= control target key end

     0   :  { %s324_s9 = smov 0   ;;  %s353_s0 = inlined_call_operand.vmem [shape: f32[2,16,32], index: 0, kind: input, shape index: {}]   ;;  %s354_s1 = inlined_call_operand.vmem [shape: f32[2,16,32], index: 1, kind: input, shape index: {}]   ;;  %s355_s2 = inlined_call_operand.vmem [shape: f32[2,16,32], index: 2, kind: output, shape index: {}]  }
   0x1 LB: > { %s277_s10 = sadd.s32 4294967295, %s307_s9   ;;  %p281_p0 = scmp.ge.s32.totalorder %s307_s9, 1  ;;  %s307_s9 = sphi %s324_s9, %s12_s9  }
   0x2   : > { %p122_p1 = scmp.lt.s32.totalorder %s307_s9, 3 }
   0x4   : > { %p123_p2 = pnand %p281_p0, %p122_p1 }
   0x5   : > { %p149_p3 = scmp.lt.s32.totalorder (!%p123_p2), %s277_s10, 1  ;;  %v173_v0 = vlaneseq (!%p123_p2)  ;;  %vm170_vm0 = vcmask (!%p123_p2), 261120   ;;  %vm177_vm1 = vcmask (!%p123_p2), 254976  }
   0x6   : > { %126 = sbr.rel (%p123_p2) target bundleno = 44 (0x2c), region = 28 }
   0x7   : > { %v174_v1 = vshrl.u32 (!%p123_p2), %v173_v0, 7 }
   0x9   : > { %v175_v2 = vsub.s32 (!%p123_p2), 0, %v174_v1  ;;  %v181_v6 = vsub.s32 (!%p123_p2), 7, %v174_v1 }
   0xd   : > { %s357_s10 = smov (!%p149_p3, %s277_s10), 1 }
   0xe   : > { %s332_s11 = sshll.u32 %s357_s10, 4 }
   0xf   : > { %s153_s14 = scalar_lea.vmem %s353_s0, %s332_s11  ;;  %s158_s17 = scalar_lea.vmem %s354_s1, %s332_s11 }
  0x10   : > { %v164_v3 = vld [vmem:[%s153_s14] sm:$0xff]  ;;  %v165_v5 = vld [vmem:[%s153_s14 + $0x8] sm:$0xff]  ;;  %s163_s20 = scalar_lea.vmem %s355_s2, %s332_s11 }
  0x11   : > { %v166_v4 = vld [vmem:[%s158_s17] sm:$0xff]  ;;  %v167_v8 = vld [vmem:[%s158_s17 + $0x8] sm:$0xff] }
  0x12   : > { %v168_v7 = vadd.f32 %v166_v4, %v164_v3  ;;  %v169_v9 = vadd.f32 %v167_v8, %v165_v5 }
  0x14   : > { %171 = vst.msk [vmem:[#allocation2 + $0x2] sm:$0xff] %vm170_vm0, %v168_v7  ;;  %v176_v10 = vrot.slane %v168_v7, %v175_v2  ;;  %172 = vst.msk [vmem:[#allocation2 + $0xa] sm:$0xff] %vm170_vm0, %v169_v9  ;;  %v182_v11 = vrot.slane %v169_v9, %v181_v6 }
  0x16   : > { %178 = vst.msk [vmem:[#allocation2] sm:$0x3] %vm177_vm1, %v176_v10  ;;  %183 = vst.msk [vmem:[#allocation2 + $0x12] sm:$0x3] %vm177_vm1, %v182_v11 }
  0x1b   : > { %v185_v12 = vld [vmem:[#allocation2 + $0x8] sm:$0xff] }
  0x1c   : > { %v189_v13 = vld [vmem:[#allocation2 + $0x9] sm:$0xff] }
  0x1d   : > { %v193_v14 = vld [vmem:[#allocation2 + $0xa] sm:$0xff]  ;;  %v191_v15 = vadd.f32 %v189_v13, %v185_v12  ;;  %v184_v16 = vld [vmem:[#allocation2] sm:$0xff] }
  0x1e   : > { %v188_v17 = vld [vmem:[#allocation2 + $0x1] sm:$0xff]  ;;  %v197_v21 = vld [vmem:[#allocation2 + $0xb] sm:$0xff] }
  0x1f   : > { %v190_v18 = vadd.f32 %v188_v17, %v184_v16  ;;  %v195_v19 = vadd.f32 %v193_v14, %v191_v15  ;;  %v192_v20 = vld [vmem:[#allocation2 + $0x2] sm:$0xff]  ;;  %v201_v25 = vld [vmem:[#allocation2 + $0xc] sm:$0xff] }
  0x20   : > { %v196_v24 = vld [vmem:[#allocation2 + $0x3] sm:$0xff] }
  0x21   : > { %v194_v22 = vadd.f32 %v192_v20, %v190_v18  ;;  %v199_v23 = vadd.f32 %v197_v21, %v195_v19  ;;  %v200_v28 = vld [vmem:[#allocation2 + $0x4] sm:$0xff] }
  0x23   : > { %v198_v26 = vadd.f32 %v196_v24, %v194_v22  ;;  %v203_v27 = vadd.f32 %v201_v25, %v199_v23 }
  0x25   : > { %v202_v29 = vadd.f32 %v200_v28, %v198_v26  ;;  %v205_v30 = vmul.f32 0.2, %v203_v27 }
  0x27   : > { %v204_v31 = vmul.f32 0.2, %v202_v29  ;;  %v207_v32 = vsub.f32 %v169_v9, %v205_v30 }
  0x29   : > { %v206_v33 = vsub.f32 %v168_v7, %v204_v31  ;;  %209 = vst.msk [vmem:[%s163_s20 + $0x8] sm:$0xff] %vm170_vm0, %v207_v32 }
  0x2b   : > { %208 = vst.msk [vmem:[%s163_s20] sm:$0xff] %vm170_vm0, %v206_v33 }
  0x2c PF: > { %s12_s9 = sadd.s32 1, %s307_s9  }
  0x2d   : > { %p9_p4 = scmp.ge.s32.totalorder %s12_s9, 4  }
  0x2f   :  { %11 = sbr.rel (!%p9_p4) target bundleno = 1 (0x1), region = 61 }

// kernel: _lambda_.17
= control target key start
LH: loop header
LB: loop body
LE: loop exit
PB: predicated region body
PF: predicated region fallthrough
CT: control target
= control target key end

     0   :  { %s344_s1 = inlined_call_operand.vmem [shape: f32[128,128], index: 1, kind: input, shape index: {}]   ;;  %s345_s0 = inlined_call_operand.vmem [shape: f32[32,128], index: 0, kind: input, shape index: {}]   ;;  %s346_s2 = inlined_call_operand.vmem [shape: f32[32,128], index: 2, kind: output, shape index: {}]  }
   0x1   :  { %v27_v0 = vld [vmem:[%s344_s1] sm:$0xff]  ;;  %v28_v1 = vld [vmem:[%s344_s1 + $0x8] sm:$0xff]  ;;  %v29_v2 = vld [vmem:[%s344_s1 + $0x10] sm:$0xff] }
   0x2   :  { %v209_v3 = vpack.c.bf16 %v28_v1, %v27_v0  ;;  %v30_v4 = vld [vmem:[%s344_s1 + $0x18] sm:$0xff]  ;;  %v31_v6 = vld [vmem:[%s344_s1 + $0x20] sm:$0xff]  ;;  %v32_v7 = vld [vmem:[%s344_s1 + $0x28] sm:$0xff] }
   0x3   :  { %v213_v5 = vpack.c.bf16 %v30_v4, %v29_v2  ;;  %v217_v8 = vpack.c.bf16 %v32_v7, %v31_v6  ;;  %v23_v9 = vld [vmem:[%s345_s0] sm:$0xff]  ;;  %v25_v10 = vld [vmem:[%s345_s0 + $0x10] sm:$0xff]  ;;  %v34_v12 = vld [vmem:[%s344_s1 + $0x38] sm:$0xff] }
   0x4   :  { %210 = vmatprep.subr.bf16.mxu0 %v209_v3  ;;  %241 = vmatprep.subr.bf16.mxu1 %v209_v3  ;;  %v33_v11 = vld [vmem:[%s344_s1 + $0x30] sm:$0xff]  ;;  %v35_v14 = vld [vmem:[%s344_s1 + $0x40] sm:$0xff]  ;;  %v36_v15 = vld [vmem:[%s344_s1 + $0x48] sm:$0xff] }
   0x5   :  { %212 = vmatpush3.bf16.msra.mxu0 %v209_v3  ;;  %249 = vmatpush3.bf16.msra.mxu1 %v209_v3  ;;  %v221_v13 = vpack.c.bf16 %v34_v12, %v33_v11  ;;  %v225_v16 = vpack.c.bf16 %v36_v15, %v35_v14  ;;  %v37_v17 = vld [vmem:[%s344_s1 + $0x50] sm:$0xff]  ;;  %v38_v18 = vld [vmem:[%s344_s1 + $0x58] sm:$0xff]  ;;  %v39_v20 = vld [vmem:[%s344_s1 + $0x60] sm:$0xff] }
   0x6   :  { %214 = vmatprep.subr.bf16.mxu0 %v213_v5  ;;  %242 = vmatprep.subr.bf16.mxu1 %v213_v5  ;;  %v229_v19 = vpack.c.bf16 %v38_v18, %v37_v17  ;;  %v40_v21 = vld [vmem:[%s344_s1 + $0x68] sm:$0xff]  ;;  %v41_v23 = vld [vmem:[%s344_s1 + $0x70] sm:$0xff]  ;;  %v42_v24 = vld [vmem:[%s344_s1 + $0x78] sm:$0xff] }
   0x7   :  { %203 = vmatprep.mubr.f32.mxu0 %v23_v9  ;;  %206 = vmatprep.mubr.f32.mxu1 %v25_v10  ;;  %v233_v22 = vpack.c.bf16 %v40_v21, %v39_v20  ;;  %v237_v25 = vpack.c.bf16 %v42_v24, %v41_v23  ;;  %v24_v26 = vld [vmem:[%s345_s0 + $0x8] sm:$0xff]  ;;  %v26_v27 = vld [vmem:[%s345_s0 + $0x18] sm:$0xff] }
   0x9   :  { %216 = vmatpush3.bf16.msra.mxu0 %v213_v5  ;;  %250 = vmatpush3.bf16.msra.mxu1 %v213_v5 }
   0xa   :  { %218 = vmatprep.subr.bf16.mxu0 %v217_v8  ;;  %243 = vmatprep.subr.bf16.mxu1 %v217_v8 }
   0xd   :  { %220 = vmatpush3.bf16.msra.mxu0 %v217_v8  ;;  %251 = vmatpush3.bf16.msra.mxu1 %v217_v8 }
   0xe   :  { %222 = vmatprep.subr.bf16.mxu0 %v221_v13  ;;  %244 = vmatprep.subr.bf16.mxu1 %v221_v13 }
  0x11   :  { %224 = vmatpush3.bf16.msra.mxu0 %v221_v13  ;;  %252 = vmatpush3.bf16.msra.mxu1 %v221_v13 }
  0x12   :  { %226 = vmatprep.subr.bf16.mxu0 %v225_v16  ;;  %245 = vmatprep.subr.bf16.mxu1 %v225_v16 }
  0x15   :  { %228 = vmatpush3.bf16.msra.mxu0 %v225_v16  ;;  %253 = vmatpush3.bf16.msra.mxu1 %v225_v16 }
  0x16   :  { %230 = vmatprep.subr.bf16.mxu0 %v229_v19  ;;  %246 = vmatprep.subr.bf16.mxu1 %v229_v19 }
  0x19   :  { %232 = vmatpush3.bf16.msra.mxu0 %v229_v19  ;;  %254 = vmatpush3.bf16.msra.mxu1 %v229_v19 }
  0x1a   :  { %234 = vmatprep.subr.bf16.mxu0 %v233_v22  ;;  %247 = vmatprep.subr.bf16.mxu1 %v233_v22 }
  0x1d   :  { %236 = vmatpush3.bf16.msra.mxu0 %v233_v22  ;;  %255 = vmatpush3.bf16.msra.mxu1 %v233_v22 }
  0x1e   :  { %238 = vmatprep.subr.bf16.mxu0 %v237_v25  ;;  %248 = vmatprep.subr.bf16.mxu1 %v237_v25 }
  0x21   :  { %240 = vmatpush3.bf16.msra.mxu0 %v237_v25  ;;  %256 = vmatpush3.bf16.msra.mxu1 %v237_v25 }
  0x24   :  { %204 = vmatmul.mubr.f32.vlgmr.msra.gmra.mrb[0].mxu0 %v24_v26  ;;  %207 = vmatmul.mubr.f32.vlgmr.msra.gmra.mrb[0].mxu1 %v26_v27 }
  0xf7   :  { %v205_v28 = vpop.f32.mrb[0].mxu0  ;;  %v208_v29 = vpop.f32.mrb[0].mxu1 }
  0xf8   :  { %144 = vst [vmem:[%s346_s2 + $0x8] sm:$0xff] %v205_v28  ;;  %146 = vst [vmem:[%s346_s2 + $0x18] sm:$0xff] %v208_v29  ;;  %v109_v30 = vpop.f32.mrb[1].mxu0  ;;  %v119_v31 = vpop.f32.mrb[1].mxu1 }
  0xf9   :  { %143 = vst [vmem:[%s346_s2] sm:$0xff] %v109_v30  ;;  %145 = vst [vmem:[%s346_s2 + $0x10] sm:$0xff] %v119_v31 }

// kernel: _lambda_.25
= control target key start
LH: loop header
LB: loop body
LE: loop exit
PB: predicated region body
PF: predicated region fallthrough
CT: control target
= control target key end

     0   :  { %8 = vsyncpa [#allocation3], 0  ;;  %s573_s0 = inlined_call_operand.vmem [shape: f32[2,16,32], index: 0, kind: input, shape index: {}]   ;;  %s574_s1 = inlined_call_operand.vmem [shape: f32[1,32], index: 1, kind: input, shape index: {}]   ;;  %s575_s2 = inlined_call_operand.vmem [shape: f32[1,32], index: 2, kind: input, shape index: {}]   ;;  %s576_s3 = inlined_call_operand.hbm [shape: f32[2,16,32], index: 3, kind: output, shape index: {}]  }
   0x1   :  { %10 = vsyncpa [#allocation3 + $0x1], 0  ;;  %s456_s12 = smov 0   ;;  %s458_s13 = smov 0  }
   0x2   :  { %s460_s14 = smov 0   ;;  %s462_s15 = smov 0  }
   0x3 LB: > { %s477_s16 = sadd.s32 4294967295, %s431_s15   ;;  %s308_s17 = sadd.s32 4294967294, %s431_s15   ;;  %s431_s15 = sphi %s462_s15, %s582_s15   ;;  %s427_s14 = sphi %s460_s14, %s581_s14   ;;  %s423_s13 = sphi %s458_s13, %s580_s13   ;;  %s419_s12 = sphi %s456_s12, %s579_s12  }
   0x4   : > { %s481_s18 = sadd.s32 1, %s431_s15   ;;  %s91_s19 = sadd.s32 1, %s427_s14 }
   0x5   : > { %s88_s20 = ssub.s32 %s431_s15, %s481_s18  ;;  %p101_p0 = scmp.ne.s32.totalorder %s427_s14, %s423_s13 }
   0x6   : > { %p89_p1 = scmp.eq.s32.totalorder %s88_s20, 0  ;;  %p102_p2 = scmp.eq.s32.totalorder %s477_s16, 1 }
   0x7   : > { %p107_p3 = scmp.ne.s32.totalorder %s423_s13, %s419_s12  ;;  %p108_p4 = scmp.eq.s32.totalorder %s308_s17, 1 }
   0x8   : > { %s492_s21 = scalar_select %p89_p1, %s427_s14, %s91_s19  }
   0x9   : > { %p494_p5 = por %p102_p2, %p101_p0  ;;  %p498_p6 = por %p108_p4, %p107_p3 }
   0xa   : > { %p311_p7 = scmp.ge.s32.totalorder %s431_s15, 1  ;;  %p140_p8 = scmp.lt.s32.totalorder %s431_s15, 3 }
   0xc   : > { %p141_p9 = pnand %p311_p7, %p140_p8 }
   0xd   : > { %p164_p10 = scmp.lt.s32.totalorder (!%p141_p9), %s477_s16, 1  ;;  %vm171_vm0 = vcmask (!%p141_p9), 261120   ;;  %v315_v21 = vld [vmem:[%s574_s1] ss:$0 sm:$0xff] (!%p141_p9)  ;;  %s161_s6 = sand.u32 (!%p141_p9), 1, %s423_s13  }
   0xe   : > { %144 = sbr.rel (%p141_p9) target bundleno = 377 (0x179), region = 32  ;;  %v316_v25 = vld [vmem:[%s575_s2] ss:$0 sm:$0xff] (!%p141_p9)  ;;  %s312_s7 = sshll.u32 (!%p141_p9), %s161_s6, 4 }
   0xf   : > { %s323_s8 = sshll.u32 (!%p141_p9), %s477_s16, 8  ;;  %s163_s9 = scalar_lea.vmem (!%p141_p9), [#allocation2], %s312_s7 }
  0x10   : > { %s246_s10 = sshll.u32 (!%p141_p9), %s163_s9, 4  ;;  %s526_s19 = scalar_lea.hbm (!%p141_p9), %s576_s3, %s323_s8  ;;  %s528_s10 = int_to_ptr.vmem [resolvable:$true] %s246_s10 }
  0x11   : > { %s369_s20 = scalar_lea.vmem (!%p141_p9), %s528_s10, 256 }
  0x12   : > { %p370_p11 = scmp.ne.s32.totalorder (!%p141_p9), %s528_s10, %s369_s20 }
  0x14   : > { %p371_p12 = pnand (!%p141_p9), %p370_p11, %p494_p5 }
  0x15   : > { %s165_s24 = scalar_select %p164_p10, %s477_s16, 1 }
  0x16   : > { %s532_s16 = scalar_lea.sflag [#allocation3], %s161_s6  ;;  %p372_p13 = pneg %p371_p12 }
  0x17   : > { %s322_s25 = sshll.u32 %s165_s24, 4  ;;  %s433_s24 = smov [#allocation2]  }
  0x18   : > { %s168_s28 = scalar_lea.vmem %s573_s0, %s322_s25  ;;  %s373_s25 = sshll.u32 %s433_s24, 4  ;;  %s374_s25 = int_to_ptr.vmem [resolvable:$false] %s373_s25 }
  0x19   : > { %v169_v0 = vld [vmem:[%s168_s28] sm:$0xff]  ;;  %v170_v1 = vld [vmem:[%s168_s28 + $0x8] sm:$0xff]  ;;  %s375_s26 = scalar_lea.vmem %s374_s25, 512  ;;  %p376_p0 = scmp.lt.s32.totalorder %s528_s10, %s374_s25 }
  0x1a   : > { %v172_v2 = vsel %vm171_vm0, %v169_v0, 0.0  ;;  %v175_v3 = vsel %vm171_vm0, %v170_v1, 0.0  ;;  %p377_p1 = scmp.lt.s32.totalorder %s375_s26, %s369_s20 }
  0x1b   : > { %173 = vadd.xlane.f32.xlu0 %v172_v2 }
  0x1c   : > { %p378_p2 = por %p377_p1, %p376_p0 }
  0x1e   : > { %p379_p3 = pnand %p378_p2, %p372_p13 }
  0x1f   : > { %176 = vadd.xlane.f32.xlu0 %v175_v3 }
  0xa8   : > { %v174_v4 = vpop.xlane.xlu0 %173 }
  0xa9   : > { %v179_v5 = vmul.f32 0.03125, %v174_v4 }
  0xab   : > { %v181_v6 = vsub.f32 %v169_v0, %v179_v5 }
  0xac   : > { %v177_v7 = vpop.xlane.xlu0 %176 }
  0xad   : > { %v180_v8 = vmul.f32 0.03125, %v177_v7  ;;  %v183_v9 = vmul.f32 %v181_v6, %v181_v6 }
  0xaf   : > { %v182_v10 = vsub.f32 %v170_v1, %v180_v8  ;;  %v185_v11 = vsel %vm171_vm0, %v183_v9, 0.0 }
  0xb0   : > { %186 = vadd.xlane.f32.xlu1 %v185_v11 }
  0xb1   : > { %v184_v12 = vmul.f32 %v182_v10, %v182_v10 }
  0xb3   : > { %v188_v13 = vsel %vm171_vm0, %v184_v12, 0.0 }
  0xb4   : > { %189 = vadd.xlane.f32.xlu1 %v188_v13 }
 0x13d   : > { %v187_v14 = vpop.xlane.xlu1 %186 }
 0x13e   : > { %v191_v15 = vmul.f32 0.03125, %v187_v14 }
 0x140   : > { %v193_v16 = vadd.f32 1e-05, %v191_v15 }
 0x141   : > { %v190_v17 = vpop.xlane.xlu1 %189 }
 0x142   : > { %365 = vrsqrt.f32 %v193_v16  ;;  %v192_v18 = vmul.f32 0.03125, %v190_v17 }
 0x144   : > { %v194_v19 = vadd.f32 1e-05, %v192_v18 }
 0x146   : > { %367 = vrsqrt.f32 %v194_v19 }
 0x14c   : > { %v366_v20 = vpop.eup %365 }
 0x14d   : > { %v197_v22 = vmul.f32 %v366_v20, %v181_v6 }
 0x14f   : > { %v206_v23 = vmul.f32 %v315_v21, %v197_v22 }
 0x150   : > { %v368_v24 = vpop.eup %367 }
 0x151   : > { %v198_v26 = vmul.f32 %v368_v24, %v182_v10  ;;  %v215_v27 = vadd.f32 %v316_v25, %v206_v23 }
 0x153   : > { %v207_v28 = vmul.f32 %v315_v21, %v198_v26  ;;  %v217_v30 = vsel %vm171_vm0, %v215_v27, 0.0 }
 0x155   : > { %v216_v29 = vadd.f32 %v316_v25, %v207_v28 }
 0x157   : > { %v218_v31 = vsel %vm171_vm0, %v216_v29, 0.0 }
 0x158   : > { %v219_v32 = vadd.f32 %v218_v31, %v217_v30 }
 0x15a   : > { %v220_v33 = vrot.slane %v219_v32, 4 }
 0x15c   : > { %v221_v34 = vadd.f32 %v220_v33, %v219_v32 }
 0x15e   : > { %v222_v35 = vrot.slane %v221_v34, 2 }
 0x160   : > { %v223_v36 = vadd.f32 %v222_v35, %v221_v34 }
 0x162   : > { %v224_v37 = vrot.slane %v223_v36, 1 }
 0x164   : > { %v225_v38 = vadd.f32 %v224_v37, %v223_v36 }
 0x166   : > { %v227_v39 = vmul.f32 0.0625, %v225_v38 }
 0x168   : > { %v228_v40 = vsub.f32 %v215_v27, %v227_v39  ;;  %v229_v41 = vsub.f32 %v216_v29, %v227_v39 }
 0x16a   : > { %230 = vst.msk [vmem:[%s163_s9] sm:$0xff] %vm171_vm0, %v228_v40  ;;  %231 = vst.msk [vmem:[%s163_s9 + $0x8] sm:$0xff] %vm171_vm0, %v229_v41 }
 0x16b   : > { %382 = shalt.err (!%p379_p3)
}
 0x16c   : > { %s383_s27 = scalar_lea.hbm %s526_s19, 256  ;;  %s387_s30 = scalar_lea.hbm %s576_s3, 512 }
 0x16d   : > { %p384_p4 = scmp.ne.s32.totalorder %s526_s19, %s383_s27  ;;  %p388_p9 = scmp.lt.u32.totalorder %s526_s19, %s576_s3 }
 0x16e   : > { %p389_p10 = scmp.lt.u32.totalorder %s387_s30, %s383_s27  ;;  %p391_p12 = scmp.lt.u32.totalorder %s383_s27, %s526_s19 }
 0x16f   : > { %p385_p7 = pnand %p384_p4, %p494_p5 }
 0x170   : > { %p390_p11 = por %p389_p10, %p388_p9 }
 0x171   : > { %p386_p8 = pneg %p385_p7 }
 0x172   : > { %p392_p13 = por %p391_p12, %p390_p11 }
 0x174   : > { %p393_p0 = pnand %p392_p13, %p386_p8 }
 0x176   : > { %396 = shalt.err (!%p393_p0)
}
 0x177   : > { %s434_s6 = smov 128   ;;  %s435_s7 = smov 8  }
 0x178   : > { %324 = dma.vmem_to_hbm [thread:$0]  (%p494_p5), %s528_s10, 256, %s526_s19, %s532_s16, %s434_s6, %s434_s6, %s435_s7  }
 0x179 PF: > { %p330_p1 = scmp.ge.s32.totalorder %s431_s15, 2  ;;  %s261_s8 = sand.u32 1, %s419_s12  }
 0x17a   : > { %s262_s9 = scalar_lea.sflag [#allocation3], %s261_s8 }
 0x17b   : > { %p327_p2 = pnand %p330_p1, %p498_p6 }
 0x17d   : > { %414 = dma.done.wait (!%p327_p2), %s262_s9, 256  }
 0x17e   : > { %416 = vsyncadd (!%p327_p2), %s262_s9, 4294967040  ;;  %p13_p3 = scmp.ge.s32.totalorder %s481_s18, 4   ;;  %s579_s12 = smov %s423_s13 }
 0x17f   : > { %s580_s13 = smov %s427_s14  ;;  %s581_s14 = smov %s492_s21 }
 0x180   : > { %s582_s15 = smov %s481_s18  ;;  %15 = sbr.rel (!%p13_p3) target bundleno = 3 (0x3), region = 67 }
 0x187   :  { %267 = vsyncpa [#allocation3], 1 }
 0x188   :  { %269 = vsyncpa [#allocation3 + $0x1], 1 }

</bundles_post_ra>
